<compile_context>
chip_gen: v7x
topology: tpu7x:2x2x1
jax: 0.10.0
libtpu: 0.0.40
codegen_flags: <defaults>
</compile_context>

<pallas_src>
import math

import jax
import jax.numpy as jnp
from jax import lax
from jax.experimental import pallas as pl
from jax.experimental.pallas import tpu as pltpu

HIDDEN_DIM = 32
INPUT_DIM = 1
NUM_LAYERS = 2
OUTPUT_DIM = 1

# ---- packed-weight row layout (all rows are 4H = 128 lanes wide) ----------
_H = HIDDEN_DIM
_G = 4 * _H
ROW_WIH0 = 0                 # (1, 4H)   W_ih layer0 (transposed; D_in = 1)
ROW_B0 = 1                   # (1, 4H)   b_ih0 + b_hh0
ROW_B1 = 2                   # (1, 4H)   b_ih1 + b_hh1
ROW_HEAD = 3                 # (1, 4H)   lanes [0:H) = linear weight, lane H = linear bias
ROW_WHH0 = 8                 # (H, 4H)   W_hh layer0 (transposed), 8-row aligned
ROW_WIH1 = 40                # (H, 4H)   W_ih layer1 (transposed)
ROW_WHH1 = 72                # (H, 4H)   W_hh layer1 (transposed)
PACK_ROWS = 104              # multiple of 8


def _lstm_kernel(x_ref, w_ref, out_ref):
    """x_ref: (T*B, 1) f32 time-major; w_ref: (PACK_ROWS, 4H) f32; out_ref: (B, 1) f32."""
    H = HIDDEN_DIM
    B = out_ref.shape[0]
    T = x_ref.shape[0] // B

    w = w_ref[...]
    wih0 = w[ROW_WIH0:ROW_WIH0 + 1, :]          # (1, 4H)
    b0 = w[ROW_B0:ROW_B0 + 1, :]                # (1, 4H)
    b1 = w[ROW_B1:ROW_B1 + 1, :]                # (1, 4H)
    head = w[ROW_HEAD:ROW_HEAD + 1, :]          # (1, 4H)

    # Recurrent-matmul RHS blocks: cast to bf16 ONCE outside the time loop so
    # every per-step dot is a single-pass bf16 MXU push (f32 accumulation).
    # TODO(synk): if the bundle dump shows the RHS being re-streamed per push,
    # pin whh0 / (wih1, whh1) in MXU weight registers via
    # pltpu.matmul_push_rhs + matmul_acc_lhs/matmul_pop.
    whh0 = w[ROW_WHH0:ROW_WHH0 + H, :].astype(jnp.bfloat16)   # (H, 4H)
    wih1 = w[ROW_WIH1:ROW_WIH1 + H, :].astype(jnp.bfloat16)   # (H, 4H)
    whh1 = w[ROW_WHH1:ROW_WHH1 + H, :].astype(jnp.bfloat16)   # (H, 4H)

    # Layer-0 input projection hoisted out of the time loop as a dense
    # (T*B, 4H) = (16, 128) slab; D_in == 1 so the "matmul" is just a
    # lane-broadcast multiply. Kept f32 (it only feeds VPU adds).
    x = x_ref[...]                              # (T*B, 1)
    xproj = x * wih0 + b0                       # (T*B, 4H), lane-dense

    def cell(gates, c_prev):
        # Full-width transcendentals first (2 EUP ops), then 32-lane slices.
        # TODO(synk): if the bundle shows serialized vrot from the 32-lane gate
        # slices, pre-rotate sig/th with pltpu.roll so the rotates issue in
        # parallel off the c/h dependency chain.
        sig = jax.nn.sigmoid(gates)             # (B, 4H) f32
        th = jnp.tanh(gates)                    # (B, 4H) f32
        i = sig[:, 0 * H:1 * H]
        f = sig[:, 1 * H:2 * H]
        g = th[:, 2 * H:3 * H]
        o = sig[:, 3 * H:4 * H]
        c = f * c_prev + i * g
        h = o * jnp.tanh(c)
        return h, c

    z = jnp.zeros((B, H), jnp.float32)          # zero initial h/c (matches torch.zeros)
    h0, c0, h1, c1 = z, z, z, z

    # T == 8: full static unroll; state stays in vregs across steps.
    # TODO(synk): if T grows, switch to lax.fori_loop(..., unroll=k) to bound
    # vreg live ranges / code size instead of extending the Python loop.
    for t in range(T):
        # Layer-1 recurrent contribution: depends only on h1 from step t-1, so
        # this push overlaps all of layer-0's work for the current step.
        g1_rec = jnp.dot(h1.astype(jnp.bfloat16), whh1,
                         preferred_element_type=jnp.float32)

        # ---- layer 0: single bf16 MXU push per step (K = H = 32) ----
        gates0 = xproj[t * B:(t + 1) * B, :] + jnp.dot(
            h0.astype(jnp.bfloat16), whh0, preferred_element_type=jnp.float32)
        h0, c0 = cell(gates0, c0)

        # ---- layer 1: split dots (no concat lane shuffle on the chain) ----
        gates1 = jnp.dot(h0.astype(jnp.bfloat16), wih1,
                         preferred_element_type=jnp.float32) + g1_rec + b1
        h1, c1 = cell(gates1, c1)

    # Final linear (H -> 1) as VPU multiply + lane reduction (no N=1 MXU push).
    wout_row = head[:, 0:H]                     # (1, H)
    bout = head[:, H:H + 1]                     # (1, 1)
    out_ref[...] = jnp.sum(h1 * wout_row, axis=-1, keepdims=True) + bout


def _pack_weights(params):
    """Pack all weights/biases + output head into one (PACK_ROWS, 4H) array.

    Called ONCE at init; the result is kept device-resident and reused every
    call (no per-call scatter/concat work in the wrapper).
    """
    H = HIDDEN_DIM
    w = jnp.zeros((PACK_ROWS, _G), jnp.float32)
    w = w.at[ROW_WIH0].set(params["wih0_t"][0])             # (4H,)
    w = w.at[ROW_B0].set(params["b0"][0])
    w = w.at[ROW_B1].set(params["b1"][0])
    head = jnp.zeros((_G,), jnp.float32)
    head = head.at[0:H].set(params["wout_t"][:, 0])
    head = head.at[H].set(params["bout"][0, 0])
    w = w.at[ROW_HEAD].set(head)
    w = w.at[ROW_WHH0:ROW_WHH0 + H].set(params["whh0_t"])
    w = w.at[ROW_WIH1:ROW_WIH1 + H].set(params["wih1_t"])
    w = w.at[ROW_WHH1:ROW_WHH1 + H].set(params["whh1_t"])
    return w


def lstm_forward(x_btd, w_packed):
    """x_btd: (B, T, D_in) float32; w_packed: (PACK_ROWS, 4H) float32.

    Returns (B, OUTPUT_DIM) float32.
    """
    B, T, D_in = x_btd.shape
    # Time-major dense 2-D input: row t*B + b holds x[b, t, 0].
    x_flat = jnp.transpose(x_btd, (1, 0, 2)).reshape(T * B, D_in)

    # Single invocation, whole-array VMEM residency (footprint ~50 KB) —
    # comfortably under the scoped VMEM limit on v5e/v6e/v7x. Batch is NOT
    # split across TensorCores: per-step latency is independent of B here.
    out = pl.pallas_call(
        _lstm_kernel,
        out_shape=jax.ShapeDtypeStruct((B, OUTPUT_DIM), jnp.float32),
        in_specs=[pl.BlockSpec(memory_space=pltpu.MemorySpace.VMEM),
                  pl.BlockSpec(memory_space=pltpu.MemorySpace.VMEM)],
        out_specs=pl.BlockSpec(memory_space=pltpu.MemorySpace.VMEM),
    )(x_flat, w_packed)
    return out


def init_params(key):
    """Deterministic init matching PyTorch's uniform(-1/sqrt(H), 1/sqrt(H))."""
    H, D_in, D_out = HIDDEN_DIM, INPUT_DIM, OUTPUT_DIM
    bound = 1.0 / math.sqrt(H)
    ks = jax.random.split(key, 10)

    def u(k, shape):
        return jax.random.uniform(k, shape, jnp.float32, -bound, bound)

    # PyTorch stores weight_ih_l{k}: (4H, in), weight_hh_l{k}: (4H, H).
    # We pass transposes so the kernel does x @ W^T; gate order [i, f, g, o].
    wih0 = u(ks[0], (4 * H, D_in))
    whh0 = u(ks[1], (4 * H, H))
    b0 = u(ks[2], (4 * H,)) + u(ks[3], (4 * H,))            # bias_ih + bias_hh
    wih1 = u(ks[4], (4 * H, H))
    whh1 = u(ks[5], (4 * H, H))
    b1 = u(ks[6], (4 * H,)) + u(ks[7], (4 * H,))
    wout = u(ks[8], (D_out, H))
    bout = u(ks[9], (D_out,))

    return {
        "wih0_t": wih0.T, "whh0_t": whh0.T, "b0": b0.reshape(1, 4 * H),
        "wih1_t": wih1.T, "whh1_t": whh1.T, "b1": b1.reshape(1, 4 * H),
        "wout_t": wout.T, "bout": bout.reshape(1, D_out),
    }


def lstm_reference(x_btd, params):
    """Pure-JAX f32 reference (same semantics as the PyTorch module)."""
    B, T, _ = x_btd.shape
    H = HIDDEN_DIM

    def cell(gates, c_prev):
        i = jax.nn.sigmoid(gates[:, 0 * H:1 * H])
        f = jax.nn.sigmoid(gates[:, 1 * H:2 * H])
        g = jnp.tanh(gates[:, 2 * H:3 * H])
        o = jax.nn.sigmoid(gates[:, 3 * H:4 * H])
        c = f * c_prev + i * g
        return o * jnp.tanh(c), c

    def step(carry, x_t):
        h0, c0, h1, c1 = carry
        g0 = x_t @ params["wih0_t"] + h0 @ params["whh0_t"] + params["b0"]
        h0, c0 = cell(g0, c0)
        g1 = h0 @ params["wih1_t"] + h1 @ params["whh1_t"] + params["b1"]
        h1, c1 = cell(g1, c1)
        return (h0, c0, h1, c1), None

    z = jnp.zeros((B, H), jnp.float32)
    (h0, c0, h1, c1), _ = lax.scan(step, (z, z, z, z),
                                   jnp.transpose(x_btd, (1, 0, 2)))
    return h1 @ params["wout_t"] + params["bout"]


if __name__ == "__main__":
    key = jax.random.PRNGKey(0)
    k_x, k_p = jax.random.split(key)

    B, T = 2, 8
    x = jax.random.normal(k_x, (B, T, INPUT_DIM), jnp.float32)
    params = init_params(k_p)

    # Pack once at init; keep device-resident (no per-call packing work).
    w_packed = jax.device_put(_pack_weights(params))

    fwd = jax.jit(lstm_forward)
    out = jax.block_until_ready(fwd(x, w_packed))

    ref = lstm_reference(x, params)
    assert out.shape == (B, OUTPUT_DIM)
    # bf16 MXU operands (f32 accumulation) vs an all-f32 reference -> relaxed
    # tolerance relative to the previous pure-f32 kernel.
    assert jnp.allclose(out, ref, atol=5e-2, rtol=5e-2), (out, ref)

    print("KERNEL_OK")
</pallas_src>

<mosaic_0001>
module attributes {stable_mosaic.version = 11 : i64} {
  func.func @_lstm_kernel(%arg0: memref<16x1xf32, #tpu.memory_space<vmem>>, %arg1: memref<104x128xf32, #tpu.memory_space<vmem>>, %arg2: memref<2x1xf32, #tpu.memory_space<vmem>>) attributes {dimension_semantics = [], scalar_prefetch = 0 : i64, scratch_operands = 0 : i64, tpu.core_type = #tpu.core_type<tc>} {
    %c0 = arith.constant 0 : index
    %c0_0 = arith.constant 0 : index
    %0 = vector.load %arg1[%c0, %c0_0] : memref<104x128xf32, #tpu.memory_space<vmem>>, vector<104x128xf32>
    %1 = vector.extract_strided_slice %0 {offsets = [0, 0], sizes = [1, 128], strides = [1, 1]} : vector<104x128xf32> to vector<1x128xf32>
    %2 = vector.extract_strided_slice %0 {offsets = [1, 0], sizes = [1, 128], strides = [1, 1]} : vector<104x128xf32> to vector<1x128xf32>
    %3 = vector.extract_strided_slice %0 {offsets = [2, 0], sizes = [1, 128], strides = [1, 1]} : vector<104x128xf32> to vector<1x128xf32>
    %4 = vector.extract_strided_slice %0 {offsets = [3, 0], sizes = [1, 128], strides = [1, 1]} : vector<104x128xf32> to vector<1x128xf32>
    %5 = vector.extract_strided_slice %0 {offsets = [8, 0], sizes = [32, 128], strides = [1, 1]} : vector<104x128xf32> to vector<32x128xf32>
    %6 = arith.truncf %5 : vector<32x128xf32> to vector<32x128xbf16>
    %7 = vector.extract_strided_slice %0 {offsets = [40, 0], sizes = [32, 128], strides = [1, 1]} : vector<104x128xf32> to vector<32x128xf32>
    %8 = arith.truncf %7 : vector<32x128xf32> to vector<32x128xbf16>
    %9 = vector.extract_strided_slice %0 {offsets = [72, 0], sizes = [32, 128], strides = [1, 1]} : vector<104x128xf32> to vector<32x128xf32>
    %10 = arith.truncf %9 : vector<32x128xf32> to vector<32x128xbf16>
    %c0_1 = arith.constant 0 : index
    %c0_2 = arith.constant 0 : index
    %11 = vector.load %arg0[%c0_1, %c0_2] : memref<16x1xf32, #tpu.memory_space<vmem>>, vector<16x1xf32>
    %12 = vector.broadcast %11 : vector<16x1xf32> to vector<16x128xf32>
    %13 = vector.broadcast %1 : vector<1x128xf32> to vector<16x128xf32>
    %14 = arith.mulf %12, %13 : vector<16x128xf32>
    %15 = vector.broadcast %2 : vector<1x128xf32> to vector<16x128xf32>
    %16 = arith.addf %14, %15 : vector<16x128xf32>
    %cst = arith.constant 0.000000e+00 : f32
    %17 = vector.broadcast %cst : f32 to vector<2x32xf32>
    %18 = arith.truncf %17 : vector<2x32xf32> to vector<2x32xbf16>
    %cst_3 = arith.constant dense<0.000000e+00> : vector<2x128xf32>
    %19 = tpu.matmul %18, %10, %cst_3 {dimension_numbers = #tpu.dot_dimension_numbers<[1], [0], [0], [1], [0, 0, 1, 1], [], []>} : vector<2x32xbf16>, vector<32x128xbf16>, vector<2x128xf32> -> vector<2x128xf32>
    %20 = vector.extract_strided_slice %16 {offsets = [0, 0], sizes = [2, 128], strides = [1, 1]} : vector<16x128xf32> to vector<2x128xf32>
    %21 = arith.truncf %17 : vector<2x32xf32> to vector<2x32xbf16>
    %cst_4 = arith.constant dense<0.000000e+00> : vector<2x128xf32>
    %22 = tpu.matmul %21, %6, %cst_4 {dimension_numbers = #tpu.dot_dimension_numbers<[1], [0], [0], [1], [0, 0, 1, 1], [], []>} : vector<2x32xbf16>, vector<32x128xbf16>, vector<2x128xf32> -> vector<2x128xf32>
    %23 = arith.addf %20, %22 : vector<2x128xf32>
    %24 = arith.negf %23 : vector<2x128xf32>
    %25 = math.exp %24 : vector<2x128xf32>
    %cst_5 = arith.constant 1.000000e+00 : f32
    %26 = vector.broadcast %cst_5 : f32 to vector<2x128xf32>
    %27 = arith.addf %26, %25 : vector<2x128xf32>
    %28 = arith.divf %26, %27 : vector<2x128xf32>
    %29 = math.tanh %23 : vector<2x128xf32>
    %30 = vector.extract_strided_slice %28 {offsets = [0, 0], sizes = [2, 32], strides = [1, 1]} : vector<2x128xf32> to vector<2x32xf32>
    %31 = vector.extract_strided_slice %28 {offsets = [0, 32], sizes = [2, 32], strides = [1, 1]} : vector<2x128xf32> to vector<2x32xf32>
    %32 = vector.extract_strided_slice %29 {offsets = [0, 64], sizes = [2, 32], strides = [1, 1]} : vector<2x128xf32> to vector<2x32xf32>
    %33 = vector.extract_strided_slice %28 {offsets = [0, 96], sizes = [2, 32], strides = [1, 1]} : vector<2x128xf32> to vector<2x32xf32>
    %34 = arith.mulf %31, %17 : vector<2x32xf32>
    %35 = arith.mulf %30, %32 : vector<2x32xf32>
    %36 = arith.addf %34, %35 : vector<2x32xf32>
    %37 = math.tanh %36 : vector<2x32xf32>
    %38 = arith.mulf %33, %37 : vector<2x32xf32>
    %39 = arith.truncf %38 : vector<2x32xf32> to vector<2x32xbf16>
    %cst_6 = arith.constant dense<0.000000e+00> : vector<2x128xf32>
    %40 = tpu.matmul %39, %8, %cst_6 {dimension_numbers = #tpu.dot_dimension_numbers<[1], [0], [0], [1], [0, 0, 1, 1], [], []>} : vector<2x32xbf16>, vector<32x128xbf16>, vector<2x128xf32> -> vector<2x128xf32>
    %41 = arith.addf %40, %19 : vector<2x128xf32>
    %42 = vector.broadcast %3 : vector<1x128xf32> to vector<2x128xf32>
    %43 = arith.addf %41, %42 : vector<2x128xf32>
    %44 = arith.negf %43 : vector<2x128xf32>
    %45 = math.exp %44 : vector<2x128xf32>
    %cst_7 = arith.constant 1.000000e+00 : f32
    %46 = vector.broadcast %cst_7 : f32 to vector<2x128xf32>
    %47 = arith.addf %46, %45 : vector<2x128xf32>
    %48 = arith.divf %46, %47 : vector<2x128xf32>
    %49 = math.tanh %43 : vector<2x128xf32>
    %50 = vector.extract_strided_slice %48 {offsets = [0, 0], sizes = [2, 32], strides = [1, 1]} : vector<2x128xf32> to vector<2x32xf32>
    %51 = vector.extract_strided_slice %48 {offsets = [0, 32], sizes = [2, 32], strides = [1, 1]} : vector<2x128xf32> to vector<2x32xf32>
    %52 = vector.extract_strided_slice %49 {offsets = [0, 64], sizes = [2, 32], strides = [1, 1]} : vector<2x128xf32> to vector<2x32xf32>
    %53 = vector.extract_strided_slice %48 {offsets = [0, 96], sizes = [2, 32], strides = [1, 1]} : vector<2x128xf32> to vector<2x32xf32>
    %54 = arith.mulf %51, %17 : vector<2x32xf32>
    %55 = arith.mulf %50, %52 : vector<2x32xf32>
    %56 = arith.addf %54, %55 : vector<2x32xf32>
    %57 = math.tanh %56 : vector<2x32xf32>
    %58 = arith.mulf %53, %57 : vector<2x32xf32>
    %59 = arith.truncf %58 : vector<2x32xf32> to vector<2x32xbf16>
    %cst_8 = arith.constant dense<0.000000e+00> : vector<2x128xf32>
    %60 = tpu.matmul %59, %10, %cst_8 {dimension_numbers = #tpu.dot_dimension_numbers<[1], [0], [0], [1], [0, 0, 1, 1], [], []>} : vector<2x32xbf16>, vector<32x128xbf16>, vector<2x128xf32> -> vector<2x128xf32>
    %61 = vector.extract_strided_slice %16 {offsets = [2, 0], sizes = [2, 128], strides = [1, 1]} : vector<16x128xf32> to vector<2x128xf32>
    %62 = arith.truncf %38 : vector<2x32xf32> to vector<2x32xbf16>
    %cst_9 = arith.constant dense<0.000000e+00> : vector<2x128xf32>
    %63 = tpu.matmul %62, %6, %cst_9 {dimension_numbers = #tpu.dot_dimension_numbers<[1], [0], [0], [1], [0, 0, 1, 1], [], []>} : vector<2x32xbf16>, vector<32x128xbf16>, vector<2x128xf32> -> vector<2x128xf32>
    %64 = arith.addf %61, %63 : vector<2x128xf32>
    %65 = arith.negf %64 : vector<2x128xf32>
    %66 = math.exp %65 : vector<2x128xf32>
    %cst_10 = arith.constant 1.000000e+00 : f32
    %67 = vector.broadcast %cst_10 : f32 to vector<2x128xf32>
    %68 = arith.addf %67, %66 : vector<2x128xf32>
    %69 = arith.divf %67, %68 : vector<2x128xf32>
    %70 = math.tanh %64 : vector<2x128xf32>
    %71 = vector.extract_strided_slice %69 {offsets = [0, 0], sizes = [2, 32], strides = [1, 1]} : vector<2x128xf32> to vector<2x32xf32>
    %72 = vector.extract_strided_slice %69 {offsets = [0, 32], sizes = [2, 32], strides = [1, 1]} : vector<2x128xf32> to vector<2x32xf32>
    %73 = vector.extract_strided_slice %70 {offsets = [0, 64], sizes = [2, 32], strides = [1, 1]} : vector<2x128xf32> to vector<2x32xf32>
    %74 = vector.extract_strided_slice %69 {offsets = [0, 96], sizes = [2, 32], strides = [1, 1]} : vector<2x128xf32> to vector<2x32xf32>
    %75 = arith.mulf %72, %36 : vector<2x32xf32>
    %76 = arith.mulf %71, %73 : vector<2x32xf32>
    %77 = arith.addf %75, %76 : vector<2x32xf32>
    %78 = math.tanh %77 : vector<2x32xf32>
    %79 = arith.mulf %74, %78 : vector<2x32xf32>
    %80 = arith.truncf %79 : vector<2x32xf32> to vector<2x32xbf16>
    %cst_11 = arith.constant dense<0.000000e+00> : vector<2x128xf32>
    %81 = tpu.matmul %80, %8, %cst_11 {dimension_numbers = #tpu.dot_dimension_numbers<[1], [0], [0], [1], [0, 0, 1, 1], [], []>} : vector<2x32xbf16>, vector<32x128xbf16>, vector<2x128xf32> -> vector<2x128xf32>
    %82 = arith.addf %81, %60 : vector<2x128xf32>
    %83 = vector.broadcast %3 : vector<1x128xf32> to vector<2x128xf32>
    %84 = arith.addf %82, %83 : vector<2x128xf32>
    %85 = arith.negf %84 : vector<2x128xf32>
    %86 = math.exp %85 : vector<2x128xf32>
    %cst_12 = arith.constant 1.000000e+00 : f32
    %87 = vector.broadcast %cst_12 : f32 to vector<2x128xf32>
    %88 = arith.addf %87, %86 : vector<2x128xf32>
    %89 = arith.divf %87, %88 : vector<2x128xf32>
    %90 = math.tanh %84 : vector<2x128xf32>
    %91 = vector.extract_strided_slice %89 {offsets = [0, 0], sizes = [2, 32], strides = [1, 1]} : vector<2x128xf32> to vector<2x32xf32>
    %92 = vector.extract_strided_slice %89 {offsets = [0, 32], sizes = [2, 32], strides = [1, 1]} : vector<2x128xf32> to vector<2x32xf32>
    %93 = vector.extract_strided_slice %90 {offsets = [0, 64], sizes = [2, 32], strides = [1, 1]} : vector<2x128xf32> to vector<2x32xf32>
    %94 = vector.extract_strided_slice %89 {offsets = [0, 96], sizes = [2, 32], strides = [1, 1]} : vector<2x128xf32> to vector<2x32xf32>
    %95 = arith.mulf %92, %56 : vector<2x32xf32>
    %96 = arith.mulf %91, %93 : vector<2x32xf32>
    %97 = arith.addf %95, %96 : vector<2x32xf32>
    %98 = math.tanh %97 : vector<2x32xf32>
    %99 = arith.mulf %94, %98 : vector<2x32xf32>
    %100 = arith.truncf %99 : vector<2x32xf32> to vector<2x32xbf16>
    %cst_13 = arith.constant dense<0.000000e+00> : vector<2x128xf32>
    %101 = tpu.matmul %100, %10, %cst_13 {dimension_numbers = #tpu.dot_dimension_numbers<[1], [0], [0], [1], [0, 0, 1, 1], [], []>} : vector<2x32xbf16>, vector<32x128xbf16>, vector<2x128xf32> -> vector<2x128xf32>
    %102 = vector.extract_strided_slice %16 {offsets = [4, 0], sizes = [2, 128], strides = [1, 1]} : vector<16x128xf32> to vector<2x128xf32>
    %103 = arith.truncf %79 : vector<2x32xf32> to vector<2x32xbf16>
    %cst_14 = arith.constant dense<0.000000e+00> : vector<2x128xf32>
    %104 = tpu.matmul %103, %6, %cst_14 {dimension_numbers = #tpu.dot_dimension_numbers<[1], [0], [0], [1], [0, 0, 1, 1], [], []>} : vector<2x32xbf16>, vector<32x128xbf16>, vector<2x128xf32> -> vector<2x128xf32>
    %105 = arith.addf %102, %104 : vector<2x128xf32>
    %106 = arith.negf %105 : vector<2x128xf32>
    %107 = math.exp %106 : vector<2x128xf32>
    %cst_15 = arith.constant 1.000000e+00 : f32
    %108 = vector.broadcast %cst_15 : f32 to vector<2x128xf32>
    %109 = arith.addf %108, %107 : vector<2x128xf32>
    %110 = arith.divf %108, %109 : vector<2x128xf32>
    %111 = math.tanh %105 : vector<2x128xf32>
    %112 = vector.extract_strided_slice %110 {offsets = [0, 0], sizes = [2, 32], strides = [1, 1]} : vector<2x128xf32> to vector<2x32xf32>
    %113 = vector.extract_strided_slice %110 {offsets = [0, 32], sizes = [2, 32], strides = [1, 1]} : vector<2x128xf32> to vector<2x32xf32>
    %114 = vector.extract_strided_slice %111 {offsets = [0, 64], sizes = [2, 32], strides = [1, 1]} : vector<2x128xf32> to vector<2x32xf32>
    %115 = vector.extract_strided_slice %110 {offsets = [0, 96], sizes = [2, 32], strides = [1, 1]} : vector<2x128xf32> to vector<2x32xf32>
    %116 = arith.mulf %113, %77 : vector<2x32xf32>
    %117 = arith.mulf %112, %114 : vector<2x32xf32>
    %118 = arith.addf %116, %117 : vector<2x32xf32>
    %119 = math.tanh %118 : vector<2x32xf32>
    %120 = arith.mulf %115, %119 : vector<2x32xf32>
    %121 = arith.truncf %120 : vector<2x32xf32> to vector<2x32xbf16>
    %cst_16 = arith.constant dense<0.000000e+00> : vector<2x128xf32>
    %122 = tpu.matmul %121, %8, %cst_16 {dimension_numbers = #tpu.dot_dimension_numbers<[1], [0], [0], [1], [0, 0, 1, 1], [], []>} : vector<2x32xbf16>, vector<32x128xbf16>, vector<2x128xf32> -> vector<2x128xf32>
    %123 = arith.addf %122, %101 : vector<2x128xf32>
    %124 = vector.broadcast %3 : vector<1x128xf32> to vector<2x128xf32>
    %125 = arith.addf %123, %124 : vector<2x128xf32>
    %126 = arith.negf %125 : vector<2x128xf32>
    %127 = math.exp %126 : vector<2x128xf32>
    %cst_17 = arith.constant 1.000000e+00 : f32
    %128 = vector.broadcast %cst_17 : f32 to vector<2x128xf32>
    %129 = arith.addf %128, %127 : vector<2x128xf32>
    %130 = arith.divf %128, %129 : vector<2x128xf32>
    %131 = math.tanh %125 : vector<2x128xf32>
    %132 = vector.extract_strided_slice %130 {offsets = [0, 0], sizes = [2, 32], strides = [1, 1]} : vector<2x128xf32> to vector<2x32xf32>
    %133 = vector.extract_strided_slice %130 {offsets = [0, 32], sizes = [2, 32], strides = [1, 1]} : vector<2x128xf32> to vector<2x32xf32>
    %134 = vector.extract_strided_slice %131 {offsets = [0, 64], sizes = [2, 32], strides = [1, 1]} : vector<2x128xf32> to vector<2x32xf32>
    %135 = vector.extract_strided_slice %130 {offsets = [0, 96], sizes = [2, 32], strides = [1, 1]} : vector<2x128xf32> to vector<2x32xf32>
    %136 = arith.mulf %133, %97 : vector<2x32xf32>
    %137 = arith.mulf %132, %134 : vector<2x32xf32>
    %138 = arith.addf %136, %137 : vector<2x32xf32>
    %139 = math.tanh %138 : vector<2x32xf32>
    %140 = arith.mulf %135, %139 : vector<2x32xf32>
    %141 = arith.truncf %140 : vector<2x32xf32> to vector<2x32xbf16>
    %cst_18 = arith.constant dense<0.000000e+00> : vector<2x128xf32>
    %142 = tpu.matmul %141, %10, %cst_18 {dimension_numbers = #tpu.dot_dimension_numbers<[1], [0], [0], [1], [0, 0, 1, 1], [], []>} : vector<2x32xbf16>, vector<32x128xbf16>, vector<2x128xf32> -> vector<2x128xf32>
    %143 = vector.extract_strided_slice %16 {offsets = [6, 0], sizes = [2, 128], strides = [1, 1]} : vector<16x128xf32> to vector<2x128xf32>
    %144 = arith.truncf %120 : vector<2x32xf32> to vector<2x32xbf16>
    %cst_19 = arith.constant dense<0.000000e+00> : vector<2x128xf32>
    %145 = tpu.matmul %144, %6, %cst_19 {dimension_numbers = #tpu.dot_dimension_numbers<[1], [0], [0], [1], [0, 0, 1, 1], [], []>} : vector<2x32xbf16>, vector<32x128xbf16>, vector<2x128xf32> -> vector<2x128xf32>
    %146 = arith.addf %143, %145 : vector<2x128xf32>
    %147 = arith.negf %146 : vector<2x128xf32>
    %148 = math.exp %147 : vector<2x128xf32>
    %cst_20 = arith.constant 1.000000e+00 : f32
    %149 = vector.broadcast %cst_20 : f32 to vector<2x128xf32>
    %150 = arith.addf %149, %148 : vector<2x128xf32>
    %151 = arith.divf %149, %150 : vector<2x128xf32>
    %152 = math.tanh %146 : vector<2x128xf32>
    %153 = vector.extract_strided_slice %151 {offsets = [0, 0], sizes = [2, 32], strides = [1, 1]} : vector<2x128xf32> to vector<2x32xf32>
    %154 = vector.extract_strided_slice %151 {offsets = [0, 32], sizes = [2, 32], strides = [1, 1]} : vector<2x128xf32> to vector<2x32xf32>
    %155 = vector.extract_strided_slice %152 {offsets = [0, 64], sizes = [2, 32], strides = [1, 1]} : vector<2x128xf32> to vector<2x32xf32>
    %156 = vector.extract_strided_slice %151 {offsets = [0, 96], sizes = [2, 32], strides = [1, 1]} : vector<2x128xf32> to vector<2x32xf32>
    %157 = arith.mulf %154, %118 : vector<2x32xf32>
    %158 = arith.mulf %153, %155 : vector<2x32xf32>
    %159 = arith.addf %157, %158 : vector<2x32xf32>
    %160 = math.tanh %159 : vector<2x32xf32>
    %161 = arith.mulf %156, %160 : vector<2x32xf32>
    %162 = arith.truncf %161 : vector<2x32xf32> to vector<2x32xbf16>
    %cst_21 = arith.constant dense<0.000000e+00> : vector<2x128xf32>
    %163 = tpu.matmul %162, %8, %cst_21 {dimension_numbers = #tpu.dot_dimension_numbers<[1], [0], [0], [1], [0, 0, 1, 1], [], []>} : vector<2x32xbf16>, vector<32x128xbf16>, vector<2x128xf32> -> vector<2x128xf32>
    %164 = arith.addf %163, %142 : vector<2x128xf32>
    %165 = vector.broadcast %3 : vector<1x128xf32> to vector<2x128xf32>
    %166 = arith.addf %164, %165 : vector<2x128xf32>
    %167 = arith.negf %166 : vector<2x128xf32>
    %168 = math.exp %167 : vector<2x128xf32>
    %cst_22 = arith.constant 1.000000e+00 : f32
    %169 = vector.broadcast %cst_22 : f32 to vector<2x128xf32>
    %170 = arith.addf %169, %168 : vector<2x128xf32>
    %171 = arith.divf %169, %170 : vector<2x128xf32>
    %172 = math.tanh %166 : vector<2x128xf32>
    %173 = vector.extract_strided_slice %171 {offsets = [0, 0], sizes = [2, 32], strides = [1, 1]} : vector<2x128xf32> to vector<2x32xf32>
    %174 = vector.extract_strided_slice %171 {offsets = [0, 32], sizes = [2, 32], strides = [1, 1]} : vector<2x128xf32> to vector<2x32xf32>
    %175 = vector.extract_strided_slice %172 {offsets = [0, 64], sizes = [2, 32], strides = [1, 1]} : vector<2x128xf32> to vector<2x32xf32>
    %176 = vector.extract_strided_slice %171 {offsets = [0, 96], sizes = [2, 32], strides = [1, 1]} : vector<2x128xf32> to vector<2x32xf32>
    %177 = arith.mulf %174, %138 : vector<2x32xf32>
    %178 = arith.mulf %173, %175 : vector<2x32xf32>
    %179 = arith.addf %177, %178 : vector<2x32xf32>
    %180 = math.tanh %179 : vector<2x32xf32>
    %181 = arith.mulf %176, %180 : vector<2x32xf32>
    %182 = arith.truncf %181 : vector<2x32xf32> to vector<2x32xbf16>
    %cst_23 = arith.constant dense<0.000000e+00> : vector<2x128xf32>
    %183 = tpu.matmul %182, %10, %cst_23 {dimension_numbers = #tpu.dot_dimension_numbers<[1], [0], [0], [1], [0, 0, 1, 1], [], []>} : vector<2x32xbf16>, vector<32x128xbf16>, vector<2x128xf32> -> vector<2x128xf32>
    %184 = vector.extract_strided_slice %16 {offsets = [8, 0], sizes = [2, 128], strides = [1, 1]} : vector<16x128xf32> to vector<2x128xf32>
    %185 = arith.truncf %161 : vector<2x32xf32> to vector<2x32xbf16>
    %cst_24 = arith.constant dense<0.000000e+00> : vector<2x128xf32>
    %186 = tpu.matmul %185, %6, %cst_24 {dimension_numbers = #tpu.dot_dimension_numbers<[1], [0], [0], [1], [0, 0, 1, 1], [], []>} : vector<2x32xbf16>, vector<32x128xbf16>, vector<2x128xf32> -> vector<2x128xf32>
    %187 = arith.addf %184, %186 : vector<2x128xf32>
    %188 = arith.negf %187 : vector<2x128xf32>
    %189 = math.exp %188 : vector<2x128xf32>
    %cst_25 = arith.constant 1.000000e+00 : f32
    %190 = vector.broadcast %cst_25 : f32 to vector<2x128xf32>
    %191 = arith.addf %190, %189 : vector<2x128xf32>
    %192 = arith.divf %190, %191 : vector<2x128xf32>
    %193 = math.tanh %187 : vector<2x128xf32>
    %194 = vector.extract_strided_slice %192 {offsets = [0, 0], sizes = [2, 32], strides = [1, 1]} : vector<2x128xf32> to vector<2x32xf32>
    %195 = vector.extract_strided_slice %192 {offsets = [0, 32], sizes = [2, 32], strides = [1, 1]} : vector<2x128xf32> to vector<2x32xf32>
    %196 = vector.extract_strided_slice %193 {offsets = [0, 64], sizes = [2, 32], strides = [1, 1]} : vector<2x128xf32> to vector<2x32xf32>
    %197 = vector.extract_strided_slice %192 {offsets = [0, 96], sizes = [2, 32], strides = [1, 1]} : vector<2x128xf32> to vector<2x32xf32>
    %198 = arith.mulf %195, %159 : vector<2x32xf32>
    %199 = arith.mulf %194, %196 : vector<2x32xf32>
    %200 = arith.addf %198, %199 : vector<2x32xf32>
    %201 = math.tanh %200 : vector<2x32xf32>
    %202 = arith.mulf %197, %201 : vector<2x32xf32>
    %203 = arith.truncf %202 : vector<2x32xf32> to vector<2x32xbf16>
    %cst_26 = arith.constant dense<0.000000e+00> : vector<2x128xf32>
    %204 = tpu.matmul %203, %8, %cst_26 {dimension_numbers = #tpu.dot_dimension_numbers<[1], [0], [0], [1], [0, 0, 1, 1], [], []>} : vector<2x32xbf16>, vector<32x128xbf16>, vector<2x128xf32> -> vector<2x128xf32>
    %205 = arith.addf %204, %183 : vector<2x128xf32>
    %206 = vector.broadcast %3 : vector<1x128xf32> to vector<2x128xf32>
    %207 = arith.addf %205, %206 : vector<2x128xf32>
    %208 = arith.negf %207 : vector<2x128xf32>
    %209 = math.exp %208 : vector<2x128xf32>
    %cst_27 = arith.constant 1.000000e+00 : f32
    %210 = vector.broadcast %cst_27 : f32 to vector<2x128xf32>
    %211 = arith.addf %210, %209 : vector<2x128xf32>
    %212 = arith.divf %210, %211 : vector<2x128xf32>
    %213 = math.tanh %207 : vector<2x128xf32>
    %214 = vector.extract_strided_slice %212 {offsets = [0, 0], sizes = [2, 32], strides = [1, 1]} : vector<2x128xf32> to vector<2x32xf32>
    %215 = vector.extract_strided_slice %212 {offsets = [0, 32], sizes = [2, 32], strides = [1, 1]} : vector<2x128xf32> to vector<2x32xf32>
    %216 = vector.extract_strided_slice %213 {offsets = [0, 64], sizes = [2, 32], strides = [1, 1]} : vector<2x128xf32> to vector<2x32xf32>
    %217 = vector.extract_strided_slice %212 {offsets = [0, 96], sizes = [2, 32], strides = [1, 1]} : vector<2x128xf32> to vector<2x32xf32>
    %218 = arith.mulf %215, %179 : vector<2x32xf32>
    %219 = arith.mulf %214, %216 : vector<2x32xf32>
    %220 = arith.addf %218, %219 : vector<2x32xf32>
    %221 = math.tanh %220 : vector<2x32xf32>
    %222 = arith.mulf %217, %221 : vector<2x32xf32>
    %223 = arith.truncf %222 : vector<2x32xf32> to vector<2x32xbf16>
    %cst_28 = arith.constant dense<0.000000e+00> : vector<2x128xf32>
    %224 = tpu.matmul %223, %10, %cst_28 {dimension_numbers = #tpu.dot_dimension_numbers<[1], [0], [0], [1], [0, 0, 1, 1], [], []>} : vector<2x32xbf16>, vector<32x128xbf16>, vector<2x128xf32> -> vector<2x128xf32>
    %225 = vector.extract_strided_slice %16 {offsets = [10, 0], sizes = [2, 128], strides = [1, 1]} : vector<16x128xf32> to vector<2x128xf32>
    %226 = arith.truncf %202 : vector<2x32xf32> to vector<2x32xbf16>
    %cst_29 = arith.constant dense<0.000000e+00> : vector<2x128xf32>
    %227 = tpu.matmul %226, %6, %cst_29 {dimension_numbers = #tpu.dot_dimension_numbers<[1], [0], [0], [1], [0, 0, 1, 1], [], []>} : vector<2x32xbf16>, vector<32x128xbf16>, vector<2x128xf32> -> vector<2x128xf32>
    %228 = arith.addf %225, %227 : vector<2x128xf32>
    %229 = arith.negf %228 : vector<2x128xf32>
    %230 = math.exp %229 : vector<2x128xf32>
    %cst_30 = arith.constant 1.000000e+00 : f32
    %231 = vector.broadcast %cst_30 : f32 to vector<2x128xf32>
    %232 = arith.addf %231, %230 : vector<2x128xf32>
    %233 = arith.divf %231, %232 : vector<2x128xf32>
    %234 = math.tanh %228 : vector<2x128xf32>
    %235 = vector.extract_strided_slice %233 {offsets = [0, 0], sizes = [2, 32], strides = [1, 1]} : vector<2x128xf32> to vector<2x32xf32>
    %236 = vector.extract_strided_slice %233 {offsets = [0, 32], sizes = [2, 32], strides = [1, 1]} : vector<2x128xf32> to vector<2x32xf32>
    %237 = vector.extract_strided_slice %234 {offsets = [0, 64], sizes = [2, 32], strides = [1, 1]} : vector<2x128xf32> to vector<2x32xf32>
    %238 = vector.extract_strided_slice %233 {offsets = [0, 96], sizes = [2, 32], strides = [1, 1]} : vector<2x128xf32> to vector<2x32xf32>
    %239 = arith.mulf %236, %200 : vector<2x32xf32>
    %240 = arith.mulf %235, %237 : vector<2x32xf32>
    %241 = arith.addf %239, %240 : vector<2x32xf32>
    %242 = math.tanh %241 : vector<2x32xf32>
    %243 = arith.mulf %238, %242 : vector<2x32xf32>
    %244 = arith.truncf %243 : vector<2x32xf32> to vector<2x32xbf16>
    %cst_31 = arith.constant dense<0.000000e+00> : vector<2x128xf32>
    %245 = tpu.matmul %244, %8, %cst_31 {dimension_numbers = #tpu.dot_dimension_numbers<[1], [0], [0], [1], [0, 0, 1, 1], [], []>} : vector<2x32xbf16>, vector<32x128xbf16>, vector<2x128xf32> -> vector<2x128xf32>
    %246 = arith.addf %245, %224 : vector<2x128xf32>
    %247 = vector.broadcast %3 : vector<1x128xf32> to vector<2x128xf32>
    %248 = arith.addf %246, %247 : vector<2x128xf32>
    %249 = arith.negf %248 : vector<2x128xf32>
    %250 = math.exp %249 : vector<2x128xf32>
    %cst_32 = arith.constant 1.000000e+00 : f32
    %251 = vector.broadcast %cst_32 : f32 to vector<2x128xf32>
    %252 = arith.addf %251, %250 : vector<2x128xf32>
    %253 = arith.divf %251, %252 : vector<2x128xf32>
    %254 = math.tanh %248 : vector<2x128xf32>
    %255 = vector.extract_strided_slice %253 {offsets = [0, 0], sizes = [2, 32], strides = [1, 1]} : vector<2x128xf32> to vector<2x32xf32>
    %256 = vector.extract_strided_slice %253 {offsets = [0, 32], sizes = [2, 32], strides = [1, 1]} : vector<2x128xf32> to vector<2x32xf32>
    %257 = vector.extract_strided_slice %254 {offsets = [0, 64], sizes = [2, 32], strides = [1, 1]} : vector<2x128xf32> to vector<2x32xf32>
    %258 = vector.extract_strided_slice %253 {offsets = [0, 96], sizes = [2, 32], strides = [1, 1]} : vector<2x128xf32> to vector<2x32xf32>
    %259 = arith.mulf %256, %220 : vector<2x32xf32>
    %260 = arith.mulf %255, %257 : vector<2x32xf32>
    %261 = arith.addf %259, %260 : vector<2x32xf32>
    %262 = math.tanh %261 : vector<2x32xf32>
    %263 = arith.mulf %258, %262 : vector<2x32xf32>
    %264 = arith.truncf %263 : vector<2x32xf32> to vector<2x32xbf16>
    %cst_33 = arith.constant dense<0.000000e+00> : vector<2x128xf32>
    %265 = tpu.matmul %264, %10, %cst_33 {dimension_numbers = #tpu.dot_dimension_numbers<[1], [0], [0], [1], [0, 0, 1, 1], [], []>} : vector<2x32xbf16>, vector<32x128xbf16>, vector<2x128xf32> -> vector<2x128xf32>
    %266 = vector.extract_strided_slice %16 {offsets = [12, 0], sizes = [2, 128], strides = [1, 1]} : vector<16x128xf32> to vector<2x128xf32>
    %267 = arith.truncf %243 : vector<2x32xf32> to vector<2x32xbf16>
    %cst_34 = arith.constant dense<0.000000e+00> : vector<2x128xf32>
    %268 = tpu.matmul %267, %6, %cst_34 {dimension_numbers = #tpu.dot_dimension_numbers<[1], [0], [0], [1], [0, 0, 1, 1], [], []>} : vector<2x32xbf16>, vector<32x128xbf16>, vector<2x128xf32> -> vector<2x128xf32>
    %269 = arith.addf %266, %268 : vector<2x128xf32>
    %270 = arith.negf %269 : vector<2x128xf32>
    %271 = math.exp %270 : vector<2x128xf32>
    %cst_35 = arith.constant 1.000000e+00 : f32
    %272 = vector.broadcast %cst_35 : f32 to vector<2x128xf32>
    %273 = arith.addf %272, %271 : vector<2x128xf32>
    %274 = arith.divf %272, %273 : vector<2x128xf32>
    %275 = math.tanh %269 : vector<2x128xf32>
    %276 = vector.extract_strided_slice %274 {offsets = [0, 0], sizes = [2, 32], strides = [1, 1]} : vector<2x128xf32> to vector<2x32xf32>
    %277 = vector.extract_strided_slice %274 {offsets = [0, 32], sizes = [2, 32], strides = [1, 1]} : vector<2x128xf32> to vector<2x32xf32>
    %278 = vector.extract_strided_slice %275 {offsets = [0, 64], sizes = [2, 32], strides = [1, 1]} : vector<2x128xf32> to vector<2x32xf32>
    %279 = vector.extract_strided_slice %274 {offsets = [0, 96], sizes = [2, 32], strides = [1, 1]} : vector<2x128xf32> to vector<2x32xf32>
    %280 = arith.mulf %277, %241 : vector<2x32xf32>
    %281 = arith.mulf %276, %278 : vector<2x32xf32>
    %282 = arith.addf %280, %281 : vector<2x32xf32>
    %283 = math.tanh %282 : vector<2x32xf32>
    %284 = arith.mulf %279, %283 : vector<2x32xf32>
    %285 = arith.truncf %284 : vector<2x32xf32> to vector<2x32xbf16>
    %cst_36 = arith.constant dense<0.000000e+00> : vector<2x128xf32>
    %286 = tpu.matmul %285, %8, %cst_36 {dimension_numbers = #tpu.dot_dimension_numbers<[1], [0], [0], [1], [0, 0, 1, 1], [], []>} : vector<2x32xbf16>, vector<32x128xbf16>, vector<2x128xf32> -> vector<2x128xf32>
    %287 = arith.addf %286, %265 : vector<2x128xf32>
    %288 = vector.broadcast %3 : vector<1x128xf32> to vector<2x128xf32>
    %289 = arith.addf %287, %288 : vector<2x128xf32>
    %290 = arith.negf %289 : vector<2x128xf32>
    %291 = math.exp %290 : vector<2x128xf32>
    %cst_37 = arith.constant 1.000000e+00 : f32
    %292 = vector.broadcast %cst_37 : f32 to vector<2x128xf32>
    %293 = arith.addf %292, %291 : vector<2x128xf32>
    %294 = arith.divf %292, %293 : vector<2x128xf32>
    %295 = math.tanh %289 : vector<2x128xf32>
    %296 = vector.extract_strided_slice %294 {offsets = [0, 0], sizes = [2, 32], strides = [1, 1]} : vector<2x128xf32> to vector<2x32xf32>
    %297 = vector.extract_strided_slice %294 {offsets = [0, 32], sizes = [2, 32], strides = [1, 1]} : vector<2x128xf32> to vector<2x32xf32>
    %298 = vector.extract_strided_slice %295 {offsets = [0, 64], sizes = [2, 32], strides = [1, 1]} : vector<2x128xf32> to vector<2x32xf32>
    %299 = vector.extract_strided_slice %294 {offsets = [0, 96], sizes = [2, 32], strides = [1, 1]} : vector<2x128xf32> to vector<2x32xf32>
    %300 = arith.mulf %297, %261 : vector<2x32xf32>
    %301 = arith.mulf %296, %298 : vector<2x32xf32>
    %302 = arith.addf %300, %301 : vector<2x32xf32>
    %303 = math.tanh %302 : vector<2x32xf32>
    %304 = arith.mulf %299, %303 : vector<2x32xf32>
    %305 = arith.truncf %304 : vector<2x32xf32> to vector<2x32xbf16>
    %cst_38 = arith.constant dense<0.000000e+00> : vector<2x128xf32>
    %306 = tpu.matmul %305, %10, %cst_38 {dimension_numbers = #tpu.dot_dimension_numbers<[1], [0], [0], [1], [0, 0, 1, 1], [], []>} : vector<2x32xbf16>, vector<32x128xbf16>, vector<2x128xf32> -> vector<2x128xf32>
    %307 = vector.extract_strided_slice %16 {offsets = [14, 0], sizes = [2, 128], strides = [1, 1]} : vector<16x128xf32> to vector<2x128xf32>
    %308 = arith.truncf %284 : vector<2x32xf32> to vector<2x32xbf16>
    %cst_39 = arith.constant dense<0.000000e+00> : vector<2x128xf32>
    %309 = tpu.matmul %308, %6, %cst_39 {dimension_numbers = #tpu.dot_dimension_numbers<[1], [0], [0], [1], [0, 0, 1, 1], [], []>} : vector<2x32xbf16>, vector<32x128xbf16>, vector<2x128xf32> -> vector<2x128xf32>
    %310 = arith.addf %307, %309 : vector<2x128xf32>
    %311 = arith.negf %310 : vector<2x128xf32>
    %312 = math.exp %311 : vector<2x128xf32>
    %cst_40 = arith.constant 1.000000e+00 : f32
    %313 = vector.broadcast %cst_40 : f32 to vector<2x128xf32>
    %314 = arith.addf %313, %312 : vector<2x128xf32>
    %315 = arith.divf %313, %314 : vector<2x128xf32>
    %316 = math.tanh %310 : vector<2x128xf32>
    %317 = vector.extract_strided_slice %315 {offsets = [0, 0], sizes = [2, 32], strides = [1, 1]} : vector<2x128xf32> to vector<2x32xf32>
    %318 = vector.extract_strided_slice %315 {offsets = [0, 32], sizes = [2, 32], strides = [1, 1]} : vector<2x128xf32> to vector<2x32xf32>
    %319 = vector.extract_strided_slice %316 {offsets = [0, 64], sizes = [2, 32], strides = [1, 1]} : vector<2x128xf32> to vector<2x32xf32>
    %320 = vector.extract_strided_slice %315 {offsets = [0, 96], sizes = [2, 32], strides = [1, 1]} : vector<2x128xf32> to vector<2x32xf32>
    %321 = arith.mulf %318, %282 : vector<2x32xf32>
    %322 = arith.mulf %317, %319 : vector<2x32xf32>
    %323 = arith.addf %321, %322 : vector<2x32xf32>
    %324 = math.tanh %323 : vector<2x32xf32>
    %325 = arith.mulf %320, %324 : vector<2x32xf32>
    %326 = arith.truncf %325 : vector<2x32xf32> to vector<2x32xbf16>
    %cst_41 = arith.constant dense<0.000000e+00> : vector<2x128xf32>
    %327 = tpu.matmul %326, %8, %cst_41 {dimension_numbers = #tpu.dot_dimension_numbers<[1], [0], [0], [1], [0, 0, 1, 1], [], []>} : vector<2x32xbf16>, vector<32x128xbf16>, vector<2x128xf32> -> vector<2x128xf32>
    %328 = arith.addf %327, %306 : vector<2x128xf32>
    %329 = vector.broadcast %3 : vector<1x128xf32> to vector<2x128xf32>
    %330 = arith.addf %328, %329 : vector<2x128xf32>
    %331 = arith.negf %330 : vector<2x128xf32>
    %332 = math.exp %331 : vector<2x128xf32>
    %cst_42 = arith.constant 1.000000e+00 : f32
    %333 = vector.broadcast %cst_42 : f32 to vector<2x128xf32>
    %334 = arith.addf %333, %332 : vector<2x128xf32>
    %335 = arith.divf %333, %334 : vector<2x128xf32>
    %336 = math.tanh %330 : vector<2x128xf32>
    %337 = vector.extract_strided_slice %335 {offsets = [0, 0], sizes = [2, 32], strides = [1, 1]} : vector<2x128xf32> to vector<2x32xf32>
    %338 = vector.extract_strided_slice %335 {offsets = [0, 32], sizes = [2, 32], strides = [1, 1]} : vector<2x128xf32> to vector<2x32xf32>
    %339 = vector.extract_strided_slice %336 {offsets = [0, 64], sizes = [2, 32], strides = [1, 1]} : vector<2x128xf32> to vector<2x32xf32>
    %340 = vector.extract_strided_slice %335 {offsets = [0, 96], sizes = [2, 32], strides = [1, 1]} : vector<2x128xf32> to vector<2x32xf32>
    %341 = arith.mulf %338, %302 : vector<2x32xf32>
    %342 = arith.mulf %337, %339 : vector<2x32xf32>
    %343 = arith.addf %341, %342 : vector<2x32xf32>
    %344 = math.tanh %343 : vector<2x32xf32>
    %345 = arith.mulf %340, %344 : vector<2x32xf32>
    %346 = vector.extract_strided_slice %4 {offsets = [0, 0], sizes = [1, 32], strides = [1, 1]} : vector<1x128xf32> to vector<1x32xf32>
    %347 = vector.extract_strided_slice %4 {offsets = [0, 32], sizes = [1, 1], strides = [1, 1]} : vector<1x128xf32> to vector<1x1xf32>
    %348 = vector.broadcast %346 : vector<1x32xf32> to vector<2x32xf32>
    %349 = arith.mulf %345, %348 : vector<2x32xf32>
    %cst_43 = arith.constant dense<0.000000e+00> : vector<2xf32>
    %350 = vector.multi_reduction <add>, %349, %cst_43 [1] : vector<2x32xf32> to vector<2xf32>
    %351 = vector.shape_cast %350 : vector<2xf32> to vector<2x1xf32>
    %352 = vector.broadcast %347 : vector<1x1xf32> to vector<2x1xf32>
    %353 = arith.addf %351, %352 : vector<2x1xf32>
    %c0_44 = arith.constant 0 : index
    %c0_45 = arith.constant 0 : index
    %354 = vector.load %arg2[%c0_44, %c0_45] : memref<2x1xf32, #tpu.memory_space<vmem>>, vector<2x1xf32>
    tpu.vector_store %arg2[%c0_44, %c0_45], %353 {strides = array<i32>} : memref<2x1xf32, #tpu.memory_space<vmem>>, vector<2x1xf32>,
    return
  }
}

</mosaic_0001>

<bundles_post_ra>
// kernel: lstm_forward.1
= control target key start
LH: loop header
LB: loop body
LE: loop exit
PB: predicated region body
PF: predicated region fallthrough
CT: control target
= control target key end

     0   :  { %7 = vsyncpa [#allocation3], 0  ;;  %s2082_s9 = smov [#allocation2]   ;;  %s2466_s0 = inlined_call_operand.vmem [shape: f32[16,1], index: 0, kind: input, shape index: {}]   ;;  %s2467_s1 = inlined_call_operand.hbm [shape: f32[104,128], index: 1, kind: input, shape index: {}]   ;;  %s2468_s2 = inlined_call_operand.vmem [shape: f32[2,1], index: 2, kind: output, shape index: {}]  }
   0x1   :  { %s15_s10 = sshll.u32 %s2082_s9, 4  ;;  %s2058_s13 = scalar_lea.hbm %s2467_s1, 1664  ;;  %s16_s10 = int_to_ptr.vmem [resolvable:$true] %s15_s10 }
   0x2   :  { %p2059_p0 = scmp.ne.s32.totalorder %s2467_s1, %s2058_s13  ;;  %p2062_p1 = scmp.lt.u32.totalorder %s2058_s13, %s2467_s1 }
   0x4   :  { %p2064_p2 = pnand %p2062_p1, %p2059_p0 }
   0x6   :  { %2067 = shalt.err (!%p2064_p2)
}
   0x7   :  { %s2068_s18 = scalar_lea.vmem %s16_s10, 1664  ;;  %p2073_p4 = scmp.lt.s32.totalorder %s16_s10, %s16_s10 }
   0x8   :  { %p2069_p3 = scmp.ne.s32.totalorder %s16_s10, %s2068_s18  ;;  %p2074_p5 = scmp.lt.s32.totalorder %s2068_s18, %s2068_s18 }
   0xa   :  { %p2075_p6 = por %p2074_p5, %p2073_p4 }
   0xc   :  { %p2076_p7 = pnand %p2075_p6, %p2069_p3 }
   0xe   :  { %2079 = shalt.err (!%p2076_p7)
}
   0xf   :  { %s2083_s19 = smov 128   ;;  %s2084_s20 = smov 8  }
  0x10   :  { %21 = dma.hbm_to_vmem [thread:$0]  %s2467_s1, 1664, %s16_s10, [#allocation3], %s2083_s19, %s2083_s19, %s2084_s20  }
  0x11   :  { %2080 = dma.done.wait [#allocation3], 1664  }
  0x12   :  { %2081 = vsyncadd [#allocation3], 4294965632  ;;  %v2085_v0 = vmov 0.0   ;;  %vm2086_vm0 = vmmov 0   ;;  %v2087_v1 = vmov 0   ;;  %v27_v2 = vld [vmem:[#allocation2 + $0x8] sm:$0xff]  ;;  %v57_v9 = vlaneseq }
  0x13   :  { %1734 = vmatprep.subr.bf16.mxu1 %v2085_v0  ;;  %1738 = vmatprep.mubr.msk.bf16.mxu1 %vm2086_vm0, %v2085_v0  ;;  %v28_v3 = vld [vmem:[#allocation2 + $0x10] sm:$0xff]  ;;  %v29_v4 = vld [vmem:[#allocation2 + $0x18] sm:$0xff]  ;;  %v30_v6 = vld [vmem:[#allocation2 + $0x20] sm:$0xff]  ;;  %s2088_s24 = smov 64   ;;  %s2089_s25 = smov 32   ;;  %vm69_vm1 = vcmask 261120  }
  0x14   :  { %1927 = vset.pattern.permute.xlu0 %v2087_v1  ;;  %1726 = vmatprep.subr.bf16.mxu0 %v2085_v0  ;;  %v2126_v5 = vpack.c.bf16 %v28_v3, %v27_v2  ;;  %v45_v7 = vld [vmem:[%s2466_s0] sm:$0xff]  ;;  %v2132_v8 = vpack.c.bf16 %v30_v6, %v29_v4  ;;  %v2140_v10 = vshrl.u32 %v57_v9, 7  ;;  %v35_v34 = vld [vmem:[#allocation2 + $0x48] sm:$0xff]  ;;  %v36_v35 = vld [vmem:[#allocation2 + $0x50] sm:$0xff]  ;;  %vm1600_vm2 = vcmask 254976  }
  0x15   :  { %1730 = vmatprep.mubr.msk.bf16.mxu0 %vm2086_vm0, %v2085_v0  ;;  %1928 = vset.pattern.permute.xlu1 %v2087_v1  ;;  %v2143_v12 = vld [vmem:[#allocation2] sm:$0xff]  ;;  %v37_v36 = vld [vmem:[#allocation2 + $0x58] sm:$0xff]  ;;  %v2162_v37 = vpack.c.bf16 %v36_v35, %v35_v34  ;;  %v31_v40 = vld [vmem:[#allocation2 + $0x28] sm:$0xff]  ;;  %vm1609_vm3 = vcmask 1024  }
  0x16   :  { %49 = vperm.xlu0 %1927, %v45_v7   ;;  %1735 = vmatpush3.bf16.msra.mxu1 %v2126_v5  ;;  %v59_v11 = vsub.s32 0, %v2140_v10  ;;  %v65_v13 = vsub.s32 1, %v2140_v10  ;;  %v38_v38 = vld [vmem:[#allocation2 + $0x60] sm:$0xff]  ;;  %v32_v41 = vld [vmem:[#allocation2 + $0x30] sm:$0xff]  ;;  %v33_v44 = vld [vmem:[#allocation2 + $0x38] sm:$0xff]  ;;  %v227_v55 = vsub.s32 2, %v2140_v10 }
  0x17   :  { %1736 = vmatprep.subr.bf16.mxu1 %v2085_v0  ;;  %1727 = vmatpush3.bf16.msra.mxu0 %v2162_v37  ;;  %v2165_v39 = vpack.c.bf16 %v38_v38, %v37_v36  ;;  %v2171_v42 = vpack.c.bf16 %v32_v41, %v31_v40  ;;  %v34_v45 = vld [vmem:[#allocation2 + $0x40] sm:$0xff] }
  0x18   :  { %v2147_v14 = vrot.slane %v2143_v12, %v59_v11  ;;  %v2151_v17 = vrot.slane %v2143_v12, %v65_v13  ;;  %1728 = vmatprep.subr.bf16.mxu0 %v2085_v0  ;;  %v2179_v46 = vpack.c.bf16 %v34_v45, %v33_v44  ;;  %v2203_v56 = vrot.slane %v2143_v12, %v227_v55 }
  0x1a   :  { %1737 = vmatpush3.bf16.msra.mxu1 %v2132_v8 }
  0x1b   :  { %1750 = vmatprep.subr.bf16.mxu1 %v2085_v0  ;;  %1729 = vmatpush3.bf16.msra.mxu0 %v2165_v39 }
  0x1c   :  { %1742 = vmatprep.subr.bf16.mxu0 %v2085_v0 }
  0x1d   :  { %1739 = vmatmul.mubr.bf16.vlgmr.msra.gmra.mrb[0].mxu1 %v2087_v1 }
  0x1e   :  { %1754 = vmatprep.mubr.msk.bf16.mxu1 %vm2086_vm0, %v2085_v0  ;;  %1751 = vmatpush3.bf16.msra.mxu1 %v2162_v37 }
  0x1f   :  { %1752 = vmatprep.subr.bf16.mxu1 %v2085_v0  ;;  %1731 = vmatmul.mubr.bf16.vlgmr.msra.gmra.mrb[0].mxu0 %v2087_v1 }
  0x20   :  { %1743 = vmatpush3.bf16.msra.mxu0 %v2171_v42  ;;  %1746 = vmatprep.mubr.msk.bf16.mxu0 %vm2086_vm0, %v2085_v0 }
  0x21   :  { %1744 = vmatprep.subr.bf16.mxu0 %v2085_v0 }
  0x22   :  { %1753 = vmatpush3.bf16.msra.mxu1 %v2165_v39 }
  0x23   :  { %1766 = vmatprep.subr.bf16.mxu1 %v2085_v0 }
  0x24   :  { %1745 = vmatpush3.bf16.msra.mxu0 %v2179_v46 }
  0x25   :  { %1758 = vmatprep.subr.bf16.mxu0 %v2085_v0 }
  0x95   :  { %v50_v15 = vpop.permute.xlu0 %49 }
  0x96   :  { %v61_v16 = vmul.f32 %v2147_v14, %v50_v15 }
  0x98   :  { %v2154_v18 = vadd.f32 %v2151_v17, %v61_v16 }
  0xf0   :  { %v147_v19 = vpop.f32.mrb[0].mxu1 }
  0xf1   :  { %v153_v20 = vadd.f32 %v147_v19, %v2154_v18  ;;  %v1740_v21 = vpop.f32.mrb[1].mxu1 }
  0xf2   :  { %v150_v22 = vpop.f32.mrb[2].mxu1  ;;  %v107_v50 = vpop.f32.mrb[0].mxu0 }
  0xf3   :  { %1929 = vtanh.f32 %v153_v20  ;;  %v1741_v23 = vpop.f32.mrb[3].mxu1  ;;  %v1616_v25 = vmul.f32 -1.442695, %v153_v20  ;;  %v1732_v51 = vpop.f32.mrb[1].mxu0 }
  0xf4   :  { %v110_v52 = vpop.f32.mrb[2].mxu0 }
  0xf5   :  { %1931 = vpow2.f32 %v1616_v25  ;;  %v1733_v53 = vpop.f32.mrb[3].mxu0 }
  0xfd   :  { %v1930_v24 = vpop.eup %1929 }
  0xfe   :  { %163 = vrot.lane.b32.xlu0 %v1930_v24, %s2088_s24 }
  0xff   :  { %v1932_v26 = vpop.eup %1931 }
 0x100   :  { %v157_v27 = vadd.f32 1.0, %v1932_v26 }
 0x102   :  { %1933 = vrcp.f32 %v157_v27 }
 0x10c   :  { %v1934_v28 = vpop.eup %1933 }
 0x10d   :  { %v161_v31 = vmul.f32 0.0, %v1934_v28 }
 0x170   :  { %v164_v29 = vpop.permute.xlu0 %163 }
 0x171   :  { %v166_v30 = vmul.f32 %v1934_v28, %v164_v29 }
 0x173   :  { %168 = vrot.lane.b32.xlu1 %v166_v30, %s2089_s25 }
 0x1e5   :  { %v169_v32 = vpop.permute.xlu1 %168 }
 0x1e6   :  { %v2159_v33 = vadd.f32 %v169_v32, %v161_v31 }
 0x1e8   :  { %1935 = vtanh.f32 %v2159_v33  ;;  %v353_v29 = vrot.slane %v2159_v33, 6 }
 0x1f2   :  { %v1936_v43 = vpop.eup %1935 }
 0x1f3   :  { %174 = vrot.lane.b32.xlu1 %v1936_v43, %s2088_s24 }
 0x265   :  { %v175_v47 = vpop.permute.xlu1 %174 }
 0x266   :  { %v177_v48 = vmul.f32 %v1934_v28, %v175_v47 }
 0x268   :  { %v178_v49 = vpack.c.bf16 %v177_v48, %v177_v48 }
 0x26a   :  { %180 = vrot.lane.b32.xlu0 %v178_v49, %s2089_s25 }
 0x2dc   :  { %v181_v54 = vpop.permute.xlu0 %180 }
 0x2dd   :  { %1747 = vmatmul.mubr.msk.bf16.vlgmr.msra.gmra.mrb[4].mxu0 %vm69_vm1, %v181_v54 }
 0x2de   :  { %1759 = vmatpush3.bf16.msra.mxu0 %v2126_v5  ;;  %1762 = vmatprep.mubr.msk.bf16.mxu0 %vm2086_vm0, %v2085_v0 }
 0x2df   :  { %1760 = vmatprep.subr.bf16.mxu0 %v2085_v0 }
 0x2e2   :  { %1761 = vmatpush3.bf16.msra.mxu0 %v2132_v8 }
 0x2e3   :  { %1774 = vmatprep.subr.bf16.mxu0 %v2085_v0 }
 0x2e5   :  { %1763 = vmatmul.mubr.msk.bf16.vlgmr.msra.gmra.mrb[8].mxu0 %vm69_vm1, %v181_v54 }
 0x2e6   :  { %1775 = vmatpush3.bf16.msra.mxu0 %v2162_v37  ;;  %1778 = vmatprep.mubr.msk.bf16.mxu0 %vm2086_vm0, %v2085_v0 }
 0x2e7   :  { %1776 = vmatprep.subr.bf16.mxu0 %v2085_v0 }
 0x2ea   :  { %1777 = vmatpush3.bf16.msra.mxu0 %v2165_v39 }
 0x2eb   :  { %1790 = vmatprep.subr.bf16.mxu0 %v2085_v0 }
 0x3b0   :  { %v219_v57 = vpop.f32.mrb[4].mxu0 }
 0x3b1   :  { %v220_v58 = vadd.f32 %v219_v57, %v107_v50  ;;  %v1748_v59 = vpop.f32.mrb[5].mxu0 }
 0x3b2   :  { %v222_v60 = vpop.f32.mrb[6].mxu0 }
 0x3b3   :  { %v229_v61 = vadd.f32 %v2203_v56, %v220_v58  ;;  %v1749_v62 = vpop.f32.mrb[7].mxu0 }
 0x3b5   :  { %1937 = vtanh.f32 %v229_v61  ;;  %v1618_v11 = vmul.f32 -1.442695, %v229_v61 }
 0x3b8   :  { %v335_v63 = vpop.f32.mrb[8].mxu0 }
 0x3b9   :  { %v342_v1 = vrot.slane %v335_v63, 6  ;;  %v1764_v2 = vpop.f32.mrb[9].mxu0 }
 0x3ba   :  { %v338_v3 = vpop.f32.mrb[10].mxu0 }
 0x3bb   :  { %v344_v4 = vadd.f32 %v342_v1, %v2154_v18  ;;  %v1765_v6 = vpop.f32.mrb[11].mxu0 }
 0x3bd   :  { %1939 = vtanh.f32 %v344_v4  ;;  %v1621_v12 = vmul.f32 -1.442695, %v344_v4 }
 0x3be   :  { %1941 = vpow2.f32 %v1618_v11 }
 0x3bf   :  { %v1938_v7 = vpop.eup %1937  ;;  %1943 = vpow2.f32 %v1621_v12 }
 0x3c0   :  { %239 = vrot.lane.b32.xlu1 %v1938_v7, %s2088_s24 }
 0x3c7   :  { %v1940_v9 = vpop.eup %1939 }
 0x3c8   :  { %357 = vrot.lane.b32.xlu0 %v1940_v9, %s2088_s24  ;;  %v1942_v13 = vpop.eup %1941 }
 0x3c9   :  { %v233_v15 = vadd.f32 1.0, %v1942_v13  ;;  %v1944_v16 = vpop.eup %1943 }
 0x3ca   :  { %v348_v19 = vadd.f32 1.0, %v1944_v16 }
 0x3cb   :  { %1945 = vrcp.f32 %v233_v15 }
 0x3cc   :  { %1947 = vrcp.f32 %v348_v19 }
 0x3d5   :  { %v1946_v20 = vpop.eup %1945 }
 0x3d6   :  { %v1948_v23 = vpop.eup %1947  ;;  %v237_v26 = vmul.f32 0.0, %v1946_v20 }
 0x3d7   :  { %v355_v30 = vmul.f32 %v1948_v23, %v353_v29 }
 0x432   :  { %v240_v21 = vpop.permute.xlu1 %239 }
 0x433   :  { %v242_v22 = vmul.f32 %v1946_v20, %v240_v21 }
 0x435   :  { %244 = vrot.lane.b32.xlu1 %v242_v22, %s2089_s25 }
 0x43a   :  { %v358_v24 = vpop.permute.xlu0 %357 }
 0x43b   :  { %v360_v25 = vmul.f32 %v1948_v23, %v358_v24 }
 0x43d   :  { %362 = vrot.lane.b32.xlu0 %v360_v25, %s2089_s25 }
 0x4a7   :  { %v245_v27 = vpop.permute.xlu1 %244 }
 0x4a8   :  { %v2211_v28 = vadd.f32 %v245_v27, %v237_v26 }
 0x4aa   :  { %1949 = vtanh.f32 %v2211_v28 }
 0x4af   :  { %v363_v31 = vpop.permute.xlu0 %362 }
 0x4b0   :  { %v2215_v32 = vadd.f32 %v363_v31, %v355_v30 }
 0x4b2   :  { %1951 = vtanh.f32 %v2215_v32  ;;  %v544_v25 = vrot.slane %v2215_v32, 6 }
 0x4b4   :  { %v1950_v34 = vpop.eup %1949 }
 0x4b5   :  { %250 = vrot.lane.b32.xlu1 %v1950_v34, %s2088_s24 }
 0x4bc   :  { %v1952_v35 = vpop.eup %1951 }
 0x4bd   :  { %368 = vrot.lane.b32.xlu0 %v1952_v35, %s2088_s24 }
 0x527   :  { %v251_v36 = vpop.permute.xlu1 %250 }
 0x528   :  { %v253_v38 = vmul.f32 %v1946_v20, %v251_v36 }
 0x52a   :  { %v254_v40 = vpack.c.bf16 %v253_v38, %v253_v38 }
 0x52c   :  { %256 = vrot.lane.b32.xlu1 %v254_v40, %s2089_s25 }
 0x52f   :  { %v369_v41 = vpop.permute.xlu0 %368 }
 0x530   :  { %v371_v43 = vmul.f32 %v1948_v23, %v369_v41 }
 0x532   :  { %v372_v33 = vpack.c.bf16 %v371_v43, %v371_v43 }
 0x534   :  { %v374_v44 = vrot.slane %v372_v33, 1 }
 0x536   :  { %375 = vrot.lane.b32.xlu0 %v374_v44, %s2089_s25 }
 0x59e   :  { %v257_v45 = vpop.permute.xlu1 %256 }
 0x59f   :  { %1755 = vmatmul.mubr.msk.bf16.vlgmr.msra.gmra.mrb[4].mxu1 %vm69_vm1, %v257_v45 }
 0x5a0   :  { %1767 = vmatpush3.bf16.msra.mxu1 %v2171_v42  ;;  %1770 = vmatprep.mubr.msk.bf16.mxu1 %vm2086_vm0, %v2085_v0 }
 0x5a1   :  { %1768 = vmatprep.subr.bf16.mxu1 %v2085_v0 }
 0x5a4   :  { %1769 = vmatpush3.bf16.msra.mxu1 %v2179_v46 }
 0x5a5   :  { %1782 = vmatprep.subr.bf16.mxu1 %v2085_v0 }
 0x5a8   :  { %v376_v47 = vpop.permute.xlu0 %375 }
 0x5a9   :  { %1771 = vmatmul.mubr.msk.bf16.vlgmr.msra.gmra.mrb[8].mxu1 %vm69_vm1, %v376_v47 }
 0x5aa   :  { %1783 = vmatpush3.bf16.msra.mxu1 %v2126_v5  ;;  %1786 = vmatprep.mubr.msk.bf16.mxu1 %vm2086_vm0, %v2085_v0 }
 0x5ab   :  { %1784 = vmatprep.subr.bf16.mxu1 %v2085_v0 }
 0x5ae   :  { %1785 = vmatpush3.bf16.msra.mxu1 %v2132_v8 }
 0x5af   :  { %1798 = vmatprep.subr.bf16.mxu1 %v2085_v0 }
 0x5b1   :  { %1787 = vmatmul.mubr.msk.bf16.vlgmr.msra.gmra.mrb[12].mxu1 %vm69_vm1, %v376_v47 }
 0x5b2   :  { %1799 = vmatpush3.bf16.msra.mxu1 %v2162_v37  ;;  %1802 = vmatprep.mubr.msk.bf16.mxu1 %vm2086_vm0, %v2085_v0 }
 0x5b3   :  { %1800 = vmatprep.subr.bf16.mxu1 %v2085_v0 }
 0x5b6   :  { %1801 = vmatpush3.bf16.msra.mxu1 %v2165_v39 }
 0x5b7   :  { %1814 = vmatprep.subr.bf16.mxu1 %v2085_v0 }
 0x672   :  { %v295_v48 = vpop.f32.mrb[4].mxu1 }
 0x673   :  { %v1756_v49 = vpop.f32.mrb[5].mxu1 }
 0x674   :  { %v298_v50 = vpop.f32.mrb[6].mxu1 }
 0x675   :  { %v1757_v51 = vpop.f32.mrb[7].mxu1 }
 0x67c   :  { %v414_v52 = vpop.f32.mrb[8].mxu1 }
 0x67d   :  { %v415_v53 = vadd.f32 %v414_v52, %v295_v48  ;;  %v1772_v54 = vpop.f32.mrb[9].mxu1 }
 0x67e   :  { %v417_v55 = vpop.f32.mrb[10].mxu1 }
 0x67f   :  { %v420_v57 = vadd.f32 %v415_v53, %v2203_v56  ;;  %v1773_v58 = vpop.f32.mrb[11].mxu1 }
 0x681   :  { %1953 = vtanh.f32 %v420_v57  ;;  %v1623_v4 = vmul.f32 -1.442695, %v420_v57 }
 0x684   :  { %v526_v59 = vpop.f32.mrb[12].mxu1 }
 0x685   :  { %v533_v60 = vrot.slane %v526_v59, 4  ;;  %v1788_v61 = vpop.f32.mrb[13].mxu1 }
 0x686   :  { %v529_v62 = vpop.f32.mrb[14].mxu1 }
 0x687   :  { %v535_v63 = vadd.f32 %v533_v60, %v2154_v18  ;;  %v1789_v1 = vpop.f32.mrb[15].mxu1 }
 0x689   :  { %1955 = vtanh.f32 %v535_v63  ;;  %v1626_v6 = vmul.f32 -1.442695, %v535_v63 }
 0x68a   :  { %1957 = vpow2.f32 %v1623_v4 }
 0x68b   :  { %v1954_v2 = vpop.eup %1953  ;;  %1959 = vpow2.f32 %v1626_v6 }
 0x68c   :  { %430 = vrot.lane.b32.xlu1 %v1954_v2, %s2088_s24 }
 0x693   :  { %v1956_v3 = vpop.eup %1955 }
 0x694   :  { %548 = vrot.lane.b32.xlu0 %v1956_v3, %s2088_s24  ;;  %v1958_v7 = vpop.eup %1957 }
 0x695   :  { %v424_v9 = vadd.f32 1.0, %v1958_v7  ;;  %v1960_v11 = vpop.eup %1959 }
 0x696   :  { %v539_v12 = vadd.f32 1.0, %v1960_v11 }
 0x697   :  { %1961 = vrcp.f32 %v424_v9 }
 0x698   :  { %1963 = vrcp.f32 %v539_v12 }
 0x6a1   :  { %v1962_v13 = vpop.eup %1961 }
 0x6a2   :  { %v1964_v19 = vpop.eup %1963  ;;  %v428_v22 = vmul.f32 %v1962_v13, %v2211_v28 }
 0x6a3   :  { %v546_v26 = vmul.f32 %v1964_v19, %v544_v25 }
 0x6fe   :  { %v431_v15 = vpop.permute.xlu1 %430 }
 0x6ff   :  { %v433_v16 = vmul.f32 %v1962_v13, %v431_v15 }
 0x701   :  { %435 = vrot.lane.b32.xlu1 %v433_v16, %s2089_s25 }
 0x706   :  { %v549_v20 = vpop.permute.xlu0 %548 }
 0x707   :  { %v551_v21 = vmul.f32 %v1964_v19, %v549_v20 }
 0x709   :  { %553 = vrot.lane.b32.xlu0 %v551_v21, %s2089_s25 }
 0x773   :  { %v436_v23 = vpop.permute.xlu1 %435 }
 0x774   :  { %v2250_v24 = vadd.f32 %v436_v23, %v428_v22 }
 0x776   :  { %1965 = vtanh.f32 %v2250_v24 }
 0x77b   :  { %v554_v27 = vpop.permute.xlu0 %553 }
 0x77c   :  { %v2254_v29 = vadd.f32 %v554_v27, %v546_v26 }
 0x77e   :  { %1967 = vtanh.f32 %v2254_v29  ;;  %v735_v20 = vrot.slane %v2254_v29, 6  ;;  %v46_v29 = vld [vmem:[%s2466_s0 + $0x8] sm:$0xff]  ;;  %s2090_s0 = smov 96  }
 0x780   :  { %v1966_v30 = vpop.eup %1965 }
 0x781   :  { %441 = vrot.lane.b32.xlu1 %v1966_v30, %s2088_s24 }
 0x788   :  { %v1968_v31 = vpop.eup %1967 }
 0x789   :  { %559 = vrot.lane.b32.xlu0 %v1968_v31, %s2088_s24 }
 0x7f3   :  { %v442_v28 = vpop.permute.xlu1 %441 }
 0x7f4   :  { %v444_v34 = vmul.f32 %v1962_v13, %v442_v28 }
 0x7f6   :  { %v445_v35 = vpack.c.bf16 %v444_v34, %v444_v34 }
 0x7f8   :  { %447 = vrot.lane.b32.xlu1 %v445_v35, %s2089_s25 }
 0x7fb   :  { %v560_v36 = vpop.permute.xlu0 %559 }
 0x7fc   :  { %v562_v38 = vmul.f32 %v1964_v19, %v560_v36 }
 0x7fe   :  { %v563_v32 = vpack.c.bf16 %v562_v38, %v562_v38 }
 0x800   :  { %v565_v40 = vrot.slane %v563_v32, 2 }
 0x802   :  { %566 = vrot.lane.b32.xlu0 %v565_v40, %s2089_s25 }
 0x86a   :  { %v448_v41 = vpop.permute.xlu1 %447 }
 0x86b   :  { %1779 = vmatmul.mubr.msk.bf16.vlgmr.msra.gmra.mrb[12].mxu0 %vm69_vm1, %v448_v41 }
 0x86c   :  { %1791 = vmatpush3.bf16.msra.mxu0 %v2171_v42  ;;  %1794 = vmatprep.mubr.msk.bf16.mxu0 %vm2086_vm0, %v2085_v0 }
 0x86d   :  { %1792 = vmatprep.subr.bf16.mxu0 %v2085_v0 }
 0x870   :  { %1793 = vmatpush3.bf16.msra.mxu0 %v2179_v46 }
 0x871   :  { %1806 = vmatprep.subr.bf16.mxu0 %v2085_v0 }
 0x874   :  { %v567_v43 = vpop.permute.xlu0 %566 }
 0x875   :  { %1795 = vmatmul.mubr.msk.bf16.vlgmr.msra.gmra.mrb[16].mxu0 %vm69_vm1, %v567_v43 }
 0x876   :  { %1807 = vmatpush3.bf16.msra.mxu0 %v2126_v5  ;;  %1810 = vmatprep.mubr.msk.bf16.mxu0 %vm2086_vm0, %v2085_v0 }
 0x877   :  { %1808 = vmatprep.subr.bf16.mxu0 %v2085_v0 }
 0x87a   :  { %1809 = vmatpush3.bf16.msra.mxu0 %v2132_v8 }
 0x87b   :  { %1822 = vmatprep.subr.bf16.mxu0 %v2085_v0 }
 0x87d   :  { %1811 = vmatmul.mubr.msk.bf16.vlgmr.msra.gmra.mrb[20].mxu0 %vm69_vm1, %v567_v43 }
 0x87e   :  { %1823 = vmatpush3.bf16.msra.mxu0 %v2162_v37  ;;  %1826 = vmatprep.mubr.msk.bf16.mxu0 %vm2086_vm0, %v2085_v0 }
 0x87f   :  { %1824 = vmatprep.subr.bf16.mxu0 %v2085_v0 }
 0x882   :  { %1825 = vmatpush3.bf16.msra.mxu0 %v2165_v39 }
 0x883   :  { %1838 = vmatprep.subr.bf16.mxu0 %v2085_v0 }
 0x93e   :  { %v486_v33 = vpop.f32.mrb[12].mxu0 }
 0x93f   :  { %v1780_v44 = vpop.f32.mrb[13].mxu0 }
 0x940   :  { %v489_v45 = vpop.f32.mrb[14].mxu0 }
 0x941   :  { %v1781_v47 = vpop.f32.mrb[15].mxu0 }
 0x948   :  { %v605_v48 = vpop.f32.mrb[16].mxu0 }
 0x949   :  { %v606_v49 = vadd.f32 %v605_v48, %v486_v33  ;;  %v1796_v50 = vpop.f32.mrb[17].mxu0 }
 0x94a   :  { %v608_v51 = vpop.f32.mrb[18].mxu0 }
 0x94b   :  { %v611_v52 = vadd.f32 %v606_v49, %v2203_v56  ;;  %v1797_v53 = vpop.f32.mrb[19].mxu0 }
 0x94d   :  { %1969 = vtanh.f32 %v611_v52  ;;  %v1628_v63 = vmul.f32 -1.442695, %v611_v52 }
 0x950   :  { %v717_v54 = vpop.f32.mrb[20].mxu0 }
 0x951   :  { %v724_v55 = vrot.slane %v717_v54, 2  ;;  %v1812_v57 = vpop.f32.mrb[21].mxu0 }
 0x952   :  { %v720_v58 = vpop.f32.mrb[22].mxu0 }
 0x953   :  { %v726_v59 = vadd.f32 %v724_v55, %v2154_v18  ;;  %v1813_v60 = vpop.f32.mrb[23].mxu0 }
 0x955   :  { %1971 = vtanh.f32 %v726_v59  ;;  %v1631_v1 = vmul.f32 -1.442695, %v726_v59 }
 0x956   :  { %1973 = vpow2.f32 %v1628_v63 }
 0x957   :  { %v1970_v61 = vpop.eup %1969  ;;  %1975 = vpow2.f32 %v1631_v1 }
 0x958   :  { %621 = vrot.lane.b32.xlu1 %v1970_v61, %s2088_s24 }
 0x95f   :  { %v1972_v62 = vpop.eup %1971 }
 0x960   :  { %739 = vrot.lane.b32.xlu0 %v1972_v62, %s2088_s24  ;;  %v1974_v2 = vpop.eup %1973 }
 0x961   :  { %v615_v3 = vadd.f32 1.0, %v1974_v2  ;;  %v1976_v4 = vpop.eup %1975 }
 0x962   :  { %v730_v6 = vadd.f32 1.0, %v1976_v4 }
 0x963   :  { %1977 = vrcp.f32 %v615_v3 }
 0x964   :  { %1979 = vrcp.f32 %v730_v6 }
 0x96d   :  { %v1978_v7 = vpop.eup %1977 }
 0x96e   :  { %v1980_v11 = vpop.eup %1979  ;;  %v619_v15 = vmul.f32 %v1978_v7, %v2250_v24 }
 0x96f   :  { %v737_v21 = vmul.f32 %v1980_v11, %v735_v20 }
 0x9ca   :  { %v622_v18 = vpop.permute.xlu1 %621 }
 0x9cb   :  { %v624_v9 = vmul.f32 %v1978_v7, %v622_v18 }
 0x9cd   :  { %626 = vrot.lane.b32.xlu1 %v624_v9, %s2089_s25 }
 0x9d2   :  { %v740_v12 = vpop.permute.xlu0 %739 }
 0x9d3   :  { %v742_v13 = vmul.f32 %v1980_v11, %v740_v12 }
 0x9d5   :  { %744 = vrot.lane.b32.xlu0 %v742_v13, %s2089_s25 }
 0xa3f   :  { %v627_v16 = vpop.permute.xlu1 %626 }
 0xa40   :  { %v2289_v19 = vadd.f32 %v627_v16, %v619_v15 }
 0xa42   :  { %1981 = vtanh.f32 %v2289_v19 }
 0xa47   :  { %v745_v22 = vpop.permute.xlu0 %744 }
 0xa48   :  { %v2293_v23 = vadd.f32 %v745_v22, %v737_v21 }
 0xa4a   :  { %1983 = vtanh.f32 %v2293_v23  ;;  %v923_v13 = vrot.slane %v2293_v23, 6 }
 0xa4c   :  { %v1982_v25 = vpop.eup %1981 }
 0xa4d   :  { %632 = vrot.lane.b32.xlu1 %v1982_v25, %s2088_s24 }
 0xa54   :  { %v1984_v26 = vpop.eup %1983 }
 0xa55   :  { %750 = vrot.lane.b32.xlu0 %v1984_v26, %s2088_s24 }
 0xabf   :  { %v633_v24 = vpop.permute.xlu1 %632 }
 0xac0   :  { %v635_v27 = vmul.f32 %v1978_v7, %v633_v24 }
 0xac2   :  { %v636_v30 = vpack.c.bf16 %v635_v27, %v635_v27 }
 0xac4   :  { %638 = vrot.lane.b32.xlu1 %v636_v30, %s2089_s25 }
 0xac7   :  { %v751_v31 = vpop.permute.xlu0 %750 }
 0xac8   :  { %v753_v28 = vmul.f32 %v1980_v11, %v751_v31  ;;  %54 = vperm.xlu1 %1928, %v46_v29  }
 0xaca   :  { %v754_v34 = vpack.c.bf16 %v753_v28, %v753_v28 }
 0xacc   :  { %v756_v35 = vrot.slane %v754_v34, 3 }
 0xace   :  { %757 = vrot.lane.b32.xlu0 %v756_v35, %s2089_s25 }
 0xb36   :  { %v639_v36 = vpop.permute.xlu1 %638 }
 0xb37   :  { %1803 = vmatmul.mubr.msk.bf16.vlgmr.msra.gmra.mrb[16].mxu1 %vm69_vm1, %v639_v36 }
 0xb38   :  { %1815 = vmatpush3.bf16.msra.mxu1 %v2171_v42  ;;  %1818 = vmatprep.mubr.msk.bf16.mxu1 %vm2086_vm0, %v2085_v0 }
 0xb39   :  { %1816 = vmatprep.subr.bf16.mxu1 %v2085_v0 }
 0xb3c   :  { %1817 = vmatpush3.bf16.msra.mxu1 %v2179_v46 }
 0xb3d   :  { %1830 = vmatprep.subr.bf16.mxu1 %v2085_v0 }
 0xb40   :  { %v758_v38 = vpop.permute.xlu0 %757 }
 0xb41   :  { %1819 = vmatmul.mubr.msk.bf16.vlgmr.msra.gmra.mrb[20].mxu1 %vm69_vm1, %v758_v38 }
 0xb42   :  { %1831 = vmatpush3.bf16.msra.mxu1 %v2126_v5  ;;  %1834 = vmatprep.mubr.msk.bf16.mxu1 %vm2086_vm0, %v2085_v0 }
 0xb43   :  { %1832 = vmatprep.subr.bf16.mxu1 %v2085_v0 }
 0xb46   :  { %1833 = vmatpush3.bf16.msra.mxu1 %v2132_v8 }
 0xb47   :  { %1846 = vmatprep.subr.bf16.mxu1 %v2085_v0  ;;  %v55_v33 = vpop.permute.xlu1 %54 }
 0xb48   :  { %v62_v48 = vmul.f32 %v2147_v14, %v55_v33 }
 0xb49   :  { %1835 = vmatmul.mubr.msk.bf16.vlgmr.msra.gmra.mrb[24].mxu1 %vm69_vm1, %v758_v38 }
 0xb4a   :  { %1847 = vmatpush3.bf16.msra.mxu1 %v2162_v37  ;;  %1850 = vmatprep.mubr.msk.bf16.mxu1 %vm2086_vm0, %v2085_v0  ;;  %v2327_v52 = vadd.f32 %v2151_v17, %v62_v48 }
 0xb4b   :  { %1848 = vmatprep.subr.bf16.mxu1 %v2085_v0 }
 0xb4e   :  { %1849 = vmatpush3.bf16.msra.mxu1 %v2165_v39 }
 0xb4f   :  { %1862 = vmatprep.subr.bf16.mxu1 %v2085_v0 }
 0xc0a   :  { %v677_v32 = vpop.f32.mrb[16].mxu1 }
 0xc0b   :  { %v1804_v40 = vpop.f32.mrb[17].mxu1 }
 0xc0c   :  { %v680_v41 = vpop.f32.mrb[18].mxu1 }
 0xc0d   :  { %v1805_v43 = vpop.f32.mrb[19].mxu1 }
 0xc14   :  { %v796_v44 = vpop.f32.mrb[20].mxu1 }
 0xc15   :  { %v797_v45 = vadd.f32 %v796_v44, %v677_v32  ;;  %v1820_v47 = vpop.f32.mrb[21].mxu1 }
 0xc16   :  { %v799_v49 = vpop.f32.mrb[22].mxu1 }
 0xc17   :  { %v802_v50 = vadd.f32 %v797_v45, %v2203_v56  ;;  %v1821_v51 = vpop.f32.mrb[23].mxu1 }
 0xc19   :  { %1985 = vtanh.f32 %v802_v50  ;;  %v1633_v14 = vmul.f32 -1.442695, %v802_v50 }
 0xc1c   :  { %v908_v53 = vpop.f32.mrb[24].mxu1 }
 0xc1d   :  { %v914_v54 = vadd.f32 %v908_v53, %v2327_v52  ;;  %v1836_v55 = vpop.f32.mrb[25].mxu1 }
 0xc1e   :  { %v911_v57 = vpop.f32.mrb[26].mxu1 }
 0xc1f   :  { %1987 = vtanh.f32 %v914_v54  ;;  %v1837_v58 = vpop.f32.mrb[27].mxu1  ;;  %v1636_v61 = vmul.f32 -1.442695, %v914_v54 }
 0xc20   :  { %1989 = vpow2.f32 %v1633_v14 }
 0xc21   :  { %1991 = vpow2.f32 %v1636_v61 }
 0xc23   :  { %v1986_v59 = vpop.eup %1985 }
 0xc24   :  { %812 = vrot.lane.b32.xlu0 %v1986_v59, %s2088_s24 }
 0xc29   :  { %v1988_v60 = vpop.eup %1987 }
 0xc2a   :  { %927 = vrot.lane.b32.xlu1 %v1988_v60, %s2088_s24  ;;  %v1990_v62 = vpop.eup %1989 }
 0xc2b   :  { %v806_v17 = vadd.f32 1.0, %v1990_v62  ;;  %v1992_v63 = vpop.eup %1991 }
 0xc2c   :  { %v918_v1 = vadd.f32 1.0, %v1992_v63 }
 0xc2d   :  { %1993 = vrcp.f32 %v806_v17 }
 0xc2e   :  { %1995 = vrcp.f32 %v918_v1 }
 0xc37   :  { %v1994_v2 = vpop.eup %1993 }
 0xc38   :  { %v1996_v6 = vpop.eup %1995  ;;  %v810_v9 = vmul.f32 %v1994_v2, %v2289_v19 }
 0xc39   :  { %v925_v15 = vmul.f32 %v1996_v6, %v923_v13 }
 0xc96   :  { %v813_v3 = vpop.permute.xlu0 %812 }
 0xc97   :  { %v815_v4 = vmul.f32 %v1994_v2, %v813_v3 }
 0xc99   :  { %817 = vrot.lane.b32.xlu0 %v815_v4, %s2089_s25 }
 0xc9c   :  { %v928_v7 = vpop.permute.xlu1 %927 }
 0xc9d   :  { %v930_v18 = vmul.f32 %v1996_v6, %v928_v7 }
 0xc9f   :  { %932 = vrot.lane.b32.xlu1 %v930_v18, %s2089_s25 }
 0xd0b   :  { %v818_v11 = vpop.permute.xlu0 %817 }
 0xd0c   :  { %v2335_v12 = vadd.f32 %v818_v11, %v810_v9 }
 0xd0e   :  { %1997 = vtanh.f32 %v2335_v12 }
 0xd11   :  { %v933_v16 = vpop.permute.xlu1 %932 }
 0xd12   :  { %v2339_v20 = vadd.f32 %v933_v16, %v925_v15 }
 0xd14   :  { %1999 = vtanh.f32 %v2339_v20  ;;  %v1113_v4 = vrot.slane %v2339_v20, 6 }
 0xd18   :  { %v1998_v21 = vpop.eup %1997 }
 0xd19   :  { %823 = vrot.lane.b32.xlu0 %v1998_v21, %s2088_s24 }
 0xd1e   :  { %v2000_v22 = vpop.eup %1999 }
 0xd1f   :  { %938 = vrot.lane.b32.xlu1 %v2000_v22, %s2088_s24 }
 0xd8b   :  { %v824_v19 = vpop.permute.xlu0 %823 }
 0xd8c   :  { %v826_v25 = vmul.f32 %v1994_v2, %v824_v19 }
 0xd8e   :  { %v827_v26 = vpack.c.bf16 %v826_v25, %v826_v25 }
 0xd90   :  { %829 = vrot.lane.b32.xlu0 %v827_v26, %s2089_s25 }
 0xd91   :  { %v939_v23 = vpop.permute.xlu1 %938 }
 0xd92   :  { %v941_v24 = vmul.f32 %v1996_v6, %v939_v23 }
 0xd94   :  { %v942_v27 = vpack.c.bf16 %v941_v24, %v941_v24 }
 0xd96   :  { %944 = vrot.lane.b32.xlu1 %v942_v27, %s2089_s25 }
 0xe02   :  { %v830_v30 = vpop.permute.xlu0 %829 }
 0xe03   :  { %1827 = vmatmul.mubr.msk.bf16.vlgmr.msra.gmra.mrb[24].mxu0 %vm69_vm1, %v830_v30 }
 0xe04   :  { %1839 = vmatpush3.bf16.msra.mxu0 %v2171_v42  ;;  %1842 = vmatprep.mubr.msk.bf16.mxu0 %vm2086_vm0, %v2085_v0 }
 0xe05   :  { %1840 = vmatprep.subr.bf16.mxu0 %v2085_v0 }
 0xe08   :  { %1841 = vmatpush3.bf16.msra.mxu0 %v2179_v46  ;;  %v945_v31 = vpop.permute.xlu1 %944 }
 0xe09   :  { %1854 = vmatprep.subr.bf16.mxu0 %v2085_v0 }
 0xe0b   :  { %1843 = vmatmul.mubr.msk.bf16.vlgmr.msra.gmra.mrb[28].mxu0 %vm69_vm1, %v945_v31 }
 0xe0c   :  { %1855 = vmatpush3.bf16.msra.mxu0 %v2126_v5  ;;  %1858 = vmatprep.mubr.msk.bf16.mxu0 %vm2086_vm0, %v2085_v0 }
 0xe0d   :  { %1856 = vmatprep.subr.bf16.mxu0 %v2085_v0 }
 0xe10   :  { %1857 = vmatpush3.bf16.msra.mxu0 %v2132_v8 }
 0xe11   :  { %1870 = vmatprep.subr.bf16.mxu0 %v2085_v0 }
 0xe13   :  { %1859 = vmatmul.mubr.msk.bf16.vlgmr.msra.gmra.mrb[32].mxu0 %vm69_vm1, %v945_v31 }
 0xe14   :  { %1871 = vmatpush3.bf16.msra.mxu0 %v2162_v37  ;;  %1874 = vmatprep.mubr.msk.bf16.mxu0 %vm2086_vm0, %v2085_v0 }
 0xe15   :  { %1872 = vmatprep.subr.bf16.mxu0 %v2085_v0 }
 0xe18   :  { %1873 = vmatpush3.bf16.msra.mxu0 %v2165_v39 }
 0xe19   :  { %1886 = vmatprep.subr.bf16.mxu0 %v2085_v0 }
 0xed6   :  { %v868_v28 = vpop.f32.mrb[24].mxu0 }
 0xed7   :  { %v1828_v29 = vpop.f32.mrb[25].mxu0 }
 0xed8   :  { %v871_v34 = vpop.f32.mrb[26].mxu0 }
 0xed9   :  { %v1829_v35 = vpop.f32.mrb[27].mxu0 }
 0xede   :  { %v983_v36 = vpop.f32.mrb[28].mxu0 }
 0xedf   :  { %v984_v38 = vadd.f32 %v983_v36, %v868_v28  ;;  %v1844_v32 = vpop.f32.mrb[29].mxu0 }
 0xee0   :  { %v986_v40 = vpop.f32.mrb[30].mxu0 }
 0xee1   :  { %v989_v41 = vadd.f32 %v984_v38, %v2203_v56  ;;  %v1845_v43 = vpop.f32.mrb[31].mxu0 }
 0xee3   :  { %2001 = vtanh.f32 %v989_v41  ;;  %v1638_v53 = vmul.f32 -1.442695, %v989_v41 }
 0xee6   :  { %v1095_v33 = vpop.f32.mrb[32].mxu0 }
 0xee7   :  { %v1102_v44 = vrot.slane %v1095_v33, 6  ;;  %v1860_v45 = vpop.f32.mrb[33].mxu0 }
 0xee8   :  { %v1098_v47 = vpop.f32.mrb[34].mxu0 }
 0xee9   :  { %v1104_v48 = vadd.f32 %v1102_v44, %v2327_v52  ;;  %v1861_v49 = vpop.f32.mrb[35].mxu0 }
 0xeeb   :  { %2003 = vtanh.f32 %v1104_v48  ;;  %v1641_v54 = vmul.f32 -1.442695, %v1104_v48 }
 0xeec   :  { %2005 = vpow2.f32 %v1638_v53 }
 0xeed   :  { %v2002_v50 = vpop.eup %2001  ;;  %2007 = vpow2.f32 %v1641_v54 }
 0xeee   :  { %999 = vrot.lane.b32.xlu0 %v2002_v50, %s2088_s24 }
 0xef5   :  { %v2004_v51 = vpop.eup %2003 }
 0xef6   :  { %1117 = vrot.lane.b32.xlu1 %v2004_v51, %s2088_s24  ;;  %v2006_v55 = vpop.eup %2005 }
 0xef7   :  { %v993_v57 = vadd.f32 1.0, %v2006_v55  ;;  %v2008_v58 = vpop.eup %2007 }
 0xef8   :  { %v1108_v59 = vadd.f32 1.0, %v2008_v58 }
 0xef9   :  { %2009 = vrcp.f32 %v993_v57 }
 0xefa   :  { %2011 = vrcp.f32 %v1108_v59 }
 0xf03   :  { %v2010_v60 = vpop.eup %2009 }
 0xf04   :  { %v2012_v62 = vpop.eup %2011  ;;  %v997_v1 = vmul.f32 %v2010_v60, %v2335_v12 }
 0xf05   :  { %v1115_v6 = vmul.f32 %v2012_v62, %v1113_v4 }
 0xf60   :  { %v1000_v14 = vpop.permute.xlu0 %999 }
 0xf61   :  { %v1002_v61 = vmul.f32 %v2010_v60, %v1000_v14 }
 0xf63   :  { %1004 = vrot.lane.b32.xlu0 %v1002_v61, %s2089_s25 }
 0xf68   :  { %v1118_v17 = vpop.permute.xlu1 %1117 }
 0xf69   :  { %v1120_v63 = vmul.f32 %v2012_v62, %v1118_v17 }
 0xf6b   :  { %1122 = vrot.lane.b32.xlu1 %v1120_v63, %s2089_s25 }
 0xfd5   :  { %v1005_v2 = vpop.permute.xlu0 %1004 }
 0xfd6   :  { %v2374_v3 = vadd.f32 %v1005_v2, %v997_v1 }
 0xfd8   :  { %2013 = vtanh.f32 %v2374_v3 }
 0xfdd   :  { %v1123_v7 = vpop.permute.xlu1 %1122 }
 0xfde   :  { %v2378_v18 = vadd.f32 %v1123_v7, %v1115_v6 }
 0xfe0   :  { %2015 = vtanh.f32 %v2378_v18  ;;  %v1304_v14 = vrot.slane %v2378_v18, 6 }
 0xfe2   :  { %v2014_v9 = vpop.eup %2013 }
 0xfe3   :  { %1010 = vrot.lane.b32.xlu0 %v2014_v9, %s2088_s24 }
 0xfea   :  { %v2016_v11 = vpop.eup %2015 }
 0xfeb   :  { %1128 = vrot.lane.b32.xlu1 %v2016_v11, %s2088_s24 }
0x1055   :  { %v1011_v12 = vpop.permute.xlu0 %1010 }
0x1056   :  { %v1013_v13 = vmul.f32 %v2010_v60, %v1011_v12 }
0x1058   :  { %v1014_v15 = vpack.c.bf16 %v1013_v13, %v1013_v13 }
0x105a   :  { %1016 = vrot.lane.b32.xlu0 %v1014_v15, %s2089_s25 }
0x105d   :  { %v1129_v16 = vpop.permute.xlu1 %1128 }
0x105e   :  { %v1131_v21 = vmul.f32 %v2012_v62, %v1129_v16 }
0x1060   :  { %v1132_v20 = vpack.c.bf16 %v1131_v21, %v1131_v21 }
0x1062   :  { %v1134_v22 = vrot.slane %v1132_v20, 1 }
0x1064   :  { %1135 = vrot.lane.b32.xlu1 %v1134_v22, %s2089_s25 }
0x10cc   :  { %v1017_v19 = vpop.permute.xlu0 %1016 }
0x10cd   :  { %1851 = vmatmul.mubr.msk.bf16.vlgmr.msra.gmra.mrb[28].mxu1 %vm69_vm1, %v1017_v19 }
0x10ce   :  { %1863 = vmatpush3.bf16.msra.mxu1 %v2171_v42  ;;  %1866 = vmatprep.mubr.msk.bf16.mxu1 %vm2086_vm0, %v2085_v0 }
0x10cf   :  { %1864 = vmatprep.subr.bf16.mxu1 %v2085_v0 }
0x10d2   :  { %1865 = vmatpush3.bf16.msra.mxu1 %v2179_v46 }
0x10d3   :  { %1878 = vmatprep.subr.bf16.mxu1 %v2085_v0 }
0x10d6   :  { %v1136_v25 = vpop.permute.xlu1 %1135 }
0x10d7   :  { %1867 = vmatmul.mubr.msk.bf16.vlgmr.msra.gmra.mrb[32].mxu1 %vm69_vm1, %v1136_v25 }
0x10d8   :  { %1879 = vmatpush3.bf16.msra.mxu1 %v2126_v5  ;;  %1882 = vmatprep.mubr.msk.bf16.mxu1 %vm2086_vm0, %v2085_v0 }
0x10d9   :  { %1880 = vmatprep.subr.bf16.mxu1 %v2085_v0 }
0x10dc   :  { %1881 = vmatpush3.bf16.msra.mxu1 %v2132_v8 }
0x10dd   :  { %1894 = vmatprep.subr.bf16.mxu1 %v2085_v0 }
0x10df   :  { %1883 = vmatmul.mubr.msk.bf16.vlgmr.msra.gmra.mrb[36].mxu1 %vm69_vm1, %v1136_v25 }
0x10e0   :  { %1895 = vmatpush3.bf16.msra.mxu1 %v2162_v37  ;;  %1898 = vmatprep.mubr.msk.bf16.mxu1 %vm2086_vm0, %v2085_v0 }
0x10e1   :  { %1896 = vmatprep.subr.bf16.mxu1 %v2085_v0 }
0x10e4   :  { %1897 = vmatpush3.bf16.msra.mxu1 %v2165_v39 }
0x10e5   :  { %1910 = vmatprep.subr.bf16.mxu1 %v2085_v0 }
0x11a0   :  { %v1055_v26 = vpop.f32.mrb[28].mxu1 }
0x11a1   :  { %v1852_v23 = vpop.f32.mrb[29].mxu1 }
0x11a2   :  { %v1058_v24 = vpop.f32.mrb[30].mxu1 }
0x11a3   :  { %v1853_v27 = vpop.f32.mrb[31].mxu1 }
0x11aa   :  { %v1174_v30 = vpop.f32.mrb[32].mxu1 }
0x11ab   :  { %v1175_v31 = vadd.f32 %v1174_v30, %v1055_v26  ;;  %v1868_v28 = vpop.f32.mrb[33].mxu1 }
0x11ac   :  { %v1177_v29 = vpop.f32.mrb[34].mxu1 }
0x11ad   :  { %v1180_v34 = vadd.f32 %v1175_v31, %v2203_v56  ;;  %v1869_v37 = vpop.f32.mrb[35].mxu1 }
0x11af   :  { %2017 = vtanh.f32 %v1180_v34  ;;  %v1643_v33 = vmul.f32 -1.442695, %v1180_v34 }
0x11b2   :  { %v1286_v35 = vpop.f32.mrb[36].mxu1 }
0x11b3   :  { %v1293_v36 = vrot.slane %v1286_v35, 4  ;;  %v1884_v38 = vpop.f32.mrb[37].mxu1 }
0x11b4   :  { %v1289_v32 = vpop.f32.mrb[38].mxu1 }
0x11b5   :  { %v1295_v39 = vadd.f32 %v1293_v36, %v2327_v52  ;;  %v1885_v40 = vpop.f32.mrb[39].mxu1 }
0x11b7   :  { %2019 = vtanh.f32 %v1295_v39  ;;  %v1646_v44 = vmul.f32 -1.442695, %v1295_v39 }
0x11b8   :  { %2021 = vpow2.f32 %v1643_v33 }
0x11b9   :  { %v2018_v41 = vpop.eup %2017  ;;  %2023 = vpow2.f32 %v1646_v44 }
0x11ba   :  { %1190 = vrot.lane.b32.xlu0 %v2018_v41, %s2088_s24 }
0x11c1   :  { %v2020_v43 = vpop.eup %2019 }
0x11c2   :  { %1308 = vrot.lane.b32.xlu1 %v2020_v43, %s2088_s24  ;;  %v2022_v45 = vpop.eup %2021 }
0x11c3   :  { %v1184_v47 = vadd.f32 1.0, %v2022_v45  ;;  %v2024_v48 = vpop.eup %2023 }
0x11c4   :  { %v1299_v49 = vadd.f32 1.0, %v2024_v48 }
0x11c5   :  { %2025 = vrcp.f32 %v1184_v47 }
0x11c6   :  { %2027 = vrcp.f32 %v1299_v49 }
0x11cf   :  { %v2026_v50 = vpop.eup %2025 }
0x11d0   :  { %v2028_v54 = vpop.eup %2027  ;;  %v1188_v58 = vmul.f32 %v2026_v50, %v2374_v3 }
0x11d1   :  { %v1306_v61 = vmul.f32 %v2028_v54, %v1304_v14 }
0x122c   :  { %v1191_v51 = vpop.permute.xlu0 %1190 }
0x122d   :  { %v1193_v53 = vmul.f32 %v2026_v50, %v1191_v51 }
0x122f   :  { %1195 = vrot.lane.b32.xlu0 %v1193_v53, %s2089_s25 }
0x1234   :  { %v1309_v55 = vpop.permute.xlu1 %1308 }
0x1235   :  { %v1311_v57 = vmul.f32 %v2028_v54, %v1309_v55 }
0x1237   :  { %1313 = vrot.lane.b32.xlu1 %v1311_v57, %s2089_s25 }
0x12a1   :  { %v1196_v59 = vpop.permute.xlu0 %1195 }
0x12a2   :  { %v2413_v60 = vadd.f32 %v1196_v59, %v1188_v58 }
0x12a4   :  { %2029 = vtanh.f32 %v2413_v60 }
0x12a9   :  { %v1314_v62 = vpop.permute.xlu1 %1313 }
0x12aa   :  { %v2417_v17 = vadd.f32 %v1314_v62, %v1306_v61 }
0x12ac   :  { %2031 = vtanh.f32 %v2417_v17  ;;  %v1495_v48 = vrot.slane %v2417_v17, 6 }
0x12ae   :  { %v2030_v63 = vpop.eup %2029 }
0x12af   :  { %1201 = vrot.lane.b32.xlu0 %v2030_v63, %s2088_s24 }
0x12b6   :  { %v2032_v1 = vpop.eup %2031 }
0x12b7   :  { %1319 = vrot.lane.b32.xlu1 %v2032_v1, %s2088_s24 }
0x1321   :  { %v1202_v2 = vpop.permute.xlu0 %1201 }
0x1322   :  { %v1204_v3 = vmul.f32 %v2026_v50, %v1202_v2 }
0x1324   :  { %v1205_v4 = vpack.c.bf16 %v1204_v3, %v1204_v3 }
0x1326   :  { %1207 = vrot.lane.b32.xlu0 %v1205_v4, %s2089_s25 }
0x1329   :  { %v1320_v6 = vpop.permute.xlu1 %1319 }
0x132a   :  { %v1322_v7 = vmul.f32 %v2028_v54, %v1320_v6 }
0x132c   :  { %v1323_v18 = vpack.c.bf16 %v1322_v7, %v1322_v7 }
0x132e   :  { %v1325_v9 = vrot.slane %v1323_v18, 2 }
0x1330   :  { %1326 = vrot.lane.b32.xlu1 %v1325_v9, %s2089_s25 }
0x1398   :  { %v1208_v11 = vpop.permute.xlu0 %1207 }
0x1399   :  { %1875 = vmatmul.mubr.msk.bf16.vlgmr.msra.gmra.mrb[36].mxu0 %vm69_vm1, %v1208_v11 }
0x139a   :  { %1887 = vmatpush3.bf16.msra.mxu0 %v2171_v42  ;;  %1890 = vmatprep.mubr.msk.bf16.mxu0 %vm2086_vm0, %v2085_v0 }
0x139b   :  { %1888 = vmatprep.subr.bf16.mxu0 %v2085_v0 }
0x139e   :  { %1889 = vmatpush3.bf16.msra.mxu0 %v2179_v46 }
0x139f   :  { %1902 = vmatprep.subr.bf16.mxu0 %v2085_v0 }
0x13a2   :  { %v1327_v12 = vpop.permute.xlu1 %1326 }
0x13a3   :  { %1891 = vmatmul.mubr.msk.bf16.vlgmr.msra.gmra.mrb[40].mxu0 %vm69_vm1, %v1327_v12 }
0x13a4   :  { %1903 = vmatpush3.bf16.msra.mxu0 %v2126_v5  ;;  %1906 = vmatprep.mubr.msk.bf16.mxu0 %vm2086_vm0, %v2085_v0 }
0x13a5   :  { %1904 = vmatprep.subr.bf16.mxu0 %v2085_v0 }
0x13a8   :  { %1905 = vmatpush3.bf16.msra.mxu0 %v2132_v8 }
0x13ab   :  { %1907 = vmatmul.mubr.msk.bf16.vlgmr.msra.gmra.mrb[44].mxu0 %vm69_vm1, %v1327_v12 }
0x146c   :  { %v1246_v13 = vpop.f32.mrb[36].mxu0 }
0x146d   :  { %v1876_v15 = vpop.f32.mrb[37].mxu0 }
0x146e   :  { %v1249_v16 = vpop.f32.mrb[38].mxu0 }
0x146f   :  { %v1877_v21 = vpop.f32.mrb[39].mxu0 }
0x1470   :  { %v1589_v21 = vsub.s32 3, %v2140_v10 }
0x1476   :  { %v1365_v20 = vpop.f32.mrb[40].mxu0 }
0x1477   :  { %v1366_v22 = vadd.f32 %v1365_v20, %v1246_v13  ;;  %v1892_v19 = vpop.f32.mrb[41].mxu0  ;;  %v2057_v20 = vld [vmem:[#allocation2] sm:$0xff] }
0x1478   :  { %v1368_v25 = vpop.f32.mrb[42].mxu0 }
0x1479   :  { %v1371_v26 = vadd.f32 %v1366_v22, %v2203_v56  ;;  %v1893_v5 = vpop.f32.mrb[43].mxu0  ;;  %v1590_v22 = vrot.slane %v2057_v20, %v1589_v21 }
0x147b   :  { %2033 = vtanh.f32 %v1371_v26  ;;  %v1648_v34 = vmul.f32 -1.442695, %v1371_v26 }
0x147e   :  { %v1477_v23 = vpop.f32.mrb[44].mxu0 }
0x147f   :  { %v1484_v24 = vrot.slane %v1477_v23, 2  ;;  %v1908_v27 = vpop.f32.mrb[45].mxu0 }
0x1480   :  { %v1480_v30 = vpop.f32.mrb[46].mxu0 }
0x1481   :  { %v1486_v8 = vadd.f32 %v1484_v24, %v2327_v52  ;;  %v1909_v31 = vpop.f32.mrb[47].mxu0 }
0x1483   :  { %2035 = vtanh.f32 %v1486_v8  ;;  %v1651_v37 = vmul.f32 -1.442695, %v1486_v8 }
0x1484   :  { %2037 = vpow2.f32 %v1648_v34 }
0x1485   :  { %v2034_v28 = vpop.eup %2033  ;;  %2039 = vpow2.f32 %v1651_v37 }
0x1486   :  { %1381 = vrot.lane.b32.xlu0 %v2034_v28, %s2088_s24 }
0x148d   :  { %v2036_v29 = vpop.eup %2035 }
0x148e   :  { %1499 = vrot.lane.b32.xlu1 %v2036_v29, %s2088_s24  ;;  %v2038_v35 = vpop.eup %2037 }
0x148f   :  { %v1375_v36 = vadd.f32 1.0, %v2038_v35  ;;  %v2040_v38 = vpop.eup %2039 }
0x1490   :  { %v1490_v32 = vadd.f32 1.0, %v2040_v38 }
0x1491   :  { %2041 = vrcp.f32 %v1375_v36 }
0x1492   :  { %2043 = vrcp.f32 %v1490_v32 }
0x149b   :  { %v2042_v39 = vpop.eup %2041 }
0x149c   :  { %v2044_v41 = vpop.eup %2043  ;;  %v1379_v44 = vmul.f32 %v2042_v39, %v2413_v60 }
0x149d   :  { %v1497_v49 = vmul.f32 %v2044_v41, %v1495_v48 }
0x14f8   :  { %v1382_v52 = vpop.permute.xlu0 %1381 }
0x14f9   :  { %v1384_v40 = vmul.f32 %v2042_v39, %v1382_v52 }
0x14fb   :  { %1386 = vrot.lane.b32.xlu0 %v1384_v40, %s2089_s25 }
0x1500   :  { %v1500_v43 = vpop.permute.xlu1 %1499 }
0x1501   :  { %v1502_v33 = vmul.f32 %v2044_v41, %v1500_v43 }
0x1503   :  { %1504 = vrot.lane.b32.xlu1 %v1502_v33, %s2089_s25 }
0x156d   :  { %v1387_v45 = vpop.permute.xlu0 %1386 }
0x156e   :  { %v1389_v47 = vadd.f32 %v1387_v45, %v1379_v44 }
0x1570   :  { %2045 = vtanh.f32 %v1389_v47 }
0x1575   :  { %v1505_v50 = vpop.permute.xlu1 %1504 }
0x1576   :  { %v1507_v51 = vadd.f32 %v1505_v50, %v1497_v49 }
0x1578   :  { %2047 = vtanh.f32 %v1507_v51 }
0x157a   :  { %v2046_v53 = vpop.eup %2045 }
0x157b   :  { %1392 = vrot.lane.b32.xlu0 %v2046_v53, %s2088_s24 }
0x1582   :  { %v2048_v54 = vpop.eup %2047 }
0x1583   :  { %1510 = vrot.lane.b32.xlu1 %v2048_v54, %s2088_s24 }
0x15ed   :  { %v1393_v55 = vpop.permute.xlu0 %1392 }
0x15ee   :  { %v1395_v57 = vmul.f32 %v2042_v39, %v1393_v55 }
0x15f0   :  { %v1396_v58 = vpack.c.bf16 %v1395_v57, %v1395_v57 }
0x15f2   :  { %1398 = vrot.lane.b32.xlu0 %v1396_v58, %s2089_s25 }
0x15f5   :  { %v1511_v59 = vpop.permute.xlu1 %1510 }
0x15f6   :  { %v1513_v60 = vmul.f32 %v2044_v41, %v1511_v59 }
0x15f8   :  { %v1514_v14 = vpack.c.bf16 %v1513_v60, %v1513_v60 }
0x15fa   :  { %v1516_v61 = vrot.slane %v1514_v14, 3 }
0x15fc   :  { %1517 = vrot.lane.b32.xlu1 %v1516_v61, %s2089_s25 }
0x1664   :  { %v1399_v62 = vpop.permute.xlu0 %1398 }
0x1665   :  { %1899 = vmatmul.mubr.msk.bf16.vlgmr.msra.gmra.mrb[40].mxu1 %vm69_vm1, %v1399_v62 }
0x1666   :  { %1911 = vmatpush3.bf16.msra.mxu1 %v2171_v42  ;;  %1914 = vmatprep.mubr.msk.bf16.mxu1 %vm2086_vm0, %v2085_v0 }
0x1667   :  { %1912 = vmatprep.subr.bf16.mxu1 %v2085_v0 }
0x166a   :  { %1913 = vmatpush3.bf16.msra.mxu1 %v2179_v46 }
0x166e   :  { %v1518_v17 = vpop.permute.xlu1 %1517 }
0x166f   :  { %1915 = vmatmul.mubr.msk.bf16.vlgmr.msra.gmra.mrb[44].mxu1 %vm69_vm1, %v1518_v17 }
0x1738   :  { %v1437_v63 = vpop.f32.mrb[40].mxu1 }
0x1739   :  { %v1900_v1 = vpop.f32.mrb[41].mxu1 }
0x173a   :  { %v1440_v2 = vpop.f32.mrb[42].mxu1 }
0x173b   :  { %v1901_v3 = vpop.f32.mrb[43].mxu1 }
0x1742   :  { %v1556_v4 = vpop.f32.mrb[44].mxu1 }
0x1743   :  { %v1557_v6 = vadd.f32 %v1556_v4, %v1437_v63  ;;  %v1916_v7 = vpop.f32.mrb[45].mxu1 }
0x1744   :  { %v1559_v18 = vpop.f32.mrb[46].mxu1 }
0x1745   :  { %v1562_v42 = vadd.f32 %v1557_v6, %v2203_v56  ;;  %v1917_v9 = vpop.f32.mrb[47].mxu1 }
0x1747   :  { %2049 = vtanh.f32 %v1562_v42  ;;  %v1653_v0 = vmul.f32 -1.442695, %v1562_v42 }
0x1749   :  { %2051 = vpow2.f32 %v1653_v0 }
0x1751   :  { %v2050_v11 = vpop.eup %2049 }
0x1752   :  { %1572 = vrot.lane.b32.xlu0 %v2050_v11, %s2088_s24 }
0x1753   :  { %v2052_v46 = vpop.eup %2051 }
0x1754   :  { %v1566_v12 = vadd.f32 1.0, %v2052_v46 }
0x1756   :  { %2053 = vrcp.f32 %v1566_v12 }
0x1760   :  { %v2054_v13 = vpop.eup %2053 }
0x1761   :  { %v1570_v56 = vmul.f32 %v2054_v13, %v1389_v47 }
0x17c4   :  { %v1573_v15 = vpop.permute.xlu0 %1572 }
0x17c5   :  { %v1575_v16 = vmul.f32 %v2054_v13, %v1573_v15 }
0x17c7   :  { %1577 = vrot.lane.b32.xlu1 %v1575_v16, %s2089_s25 }
0x17cb   :  { %1592 = vrot.lane.b32.xlu1 %v1590_v22, %s2090_s0 }
0x1839   :  { %v1578_v19 = vpop.permute.xlu1 %1577 }
0x183a   :  { %v1580_v25 = vadd.f32 %v1578_v19, %v1570_v56 }
0x183c   :  { %2055 = vtanh.f32 %v1580_v25 }
0x183d   :  { %v1593_v23 = vpop.permute.xlu1 %1592 }
0x1846   :  { %v2056_v26 = vpop.eup %2055 }
0x1847   :  { %1583 = vrot.lane.b32.xlu0 %v2056_v26, %s2088_s24 }
0x18b9   :  { %v1584_v5 = vpop.permute.xlu0 %1583 }
0x18ba   :  { %v1586_v24 = vmul.f32 %v2054_v13, %v1584_v5 }
0x18bc   :  { %v1595_v27 = vmul.f32 %v1593_v23, %v1586_v24 }
0x18be   :  { %1597 = vrot.lane.b32.xlu0 %v1595_v27, %s2089_s25 }
0x1930   :  { %v1598_v10 = vpop.permute.xlu0 %1597 }
0x1931   :  { %v1601_v30 = vsel %vm1600_vm2, %v1598_v10, 0.0 }
0x1932   :  { %1602 = vadd.xlane.f32.xlu1 %v1601_v30 }
0x19bf   :  { %v1603_v8 = vpop.xlane.xlu1 %1602 }
0x19c0   :  { %v1604_v31 = vadd.f32 %v1603_v8, %v1590_v22 }
0x19c2   :  { %1606 = vrot.lane.b32.xlu0 %v1604_v31, %s2090_s0 }
0x1a34   :  { %v1607_v28 = vpop.permute.xlu0 %1606 }
0x1a35   :  { %1610 = vst.msk [vmem:[%s2468_s2] sm:$0x3] %vm1609_vm3, %v1607_v28 }
0x1a36   :  { %1615 = vsyncpa [#allocation3], 1 }

</bundles_post_ra>
